<compile_context>
chip_gen: v5e
topology: v5e:2x2
jax: 0.10.0
libtpu: 0.0.40
codegen_flags: <defaults>
</compile_context>

<pallas_src>
import functools

import jax
import jax.numpy as jnp
from jax.experimental import pallas as pl
from jax.experimental.pallas import tpu as pltpu

# 3x3 taps excluding the center (k=4). This order is shared by the weight
# folding, the host-precomputed masks, and the in-kernel roll shifts.
NONCENTER_TAPS = (0, 1, 2, 3, 5, 6, 7, 8)


def fused_stage_kernel(x_ref, mask_ref, w1f_ref, b_ref, w2t_ref, o_ref, im_ref,
                       *, Cc, C, depth, shifts):
    """Fused BasicStage forward, channel-major, batch folded into lanes.

    x_ref:    (1, C, LW)           activations, LW = B*H*W (B images lane-folded)
    mask_ref: (8, Cc, LW) f32      per-tap edge/validity masks (host precomputed)
    w1f_ref:  (depth, hidden, Kf)  bf16 folded weight (conv3x3 + BN scale folded
                                   into the first 1x1 conv); columns ordered as
                                   [xt (C cols) | 8 shifted taps (Cc cols each)]
    b_ref:    (depth, hidden, 1)   f32 fused BN shift (beta - mean*scale)
    w2t_ref:  (depth, C, hidden)   bf16 second 1x1 conv (y = W2 @ h)
    o_ref:    (1, C, LW)           output
    im_ref:   (Kf, LW) f32         VMEM scratch holding the im2col matrix
    """
    xt = x_ref[0]                                   # (C, LW), spatial*batch in lanes

    for d in range(depth):                          # depth=2, statically unrolled
        x1 = xt[:Cc, :]                             # conv'd channels (Cc, LW)

        # im2col staged through VMEM at 8-sublane-friendly offsets:
        #   rows 0..C-1   = xt itself (center tap + untouched channels): full tiles
        #   rows C+t*Cc.. = t-th shifted tap, masked for image edges / image crossings
        im_ref[pl.ds(0, C), :] = xt
        for t, shift in enumerate(shifts):
            im_ref[pl.ds(C + t * Cc, Cc), :] = (
                pltpu.roll(x1, shift=shift, axis=1) * mask_ref[t])

        # conv3x3 + 1x1 conv + BN scale collapsed into one MXU pass.
        # bf16 operands, f32 accumulation; elementwise work stays f32.
        h = jnp.dot(w1f_ref[d], im_ref[...].astype(jnp.bfloat16),
                    preferred_element_type=jnp.float32)        # (hidden, LW)
        h = jnp.maximum(h + b_ref[d], 0.0)                      # BN shift + ReLU
        y = jnp.dot(w2t_ref[d], h.astype(jnp.bfloat16),
                    preferred_element_type=jnp.float32)         # (C, LW)

        xt = xt + y                                  # residual (drop_path = Identity)

    o_ref[0] = xt.astype(o_ref.dtype)                # lane-dense full-width store


# ------------------------------ wrapper ---------------------------------------
def _tap_masks(H, W, Cc, B):
    """(8, Cc, B*H*W) f32 validity masks. They depend only on the within-image
    position, so they also zero every cross-image wraparound of the global roll."""
    HW = H * W
    q = jnp.arange(HW, dtype=jnp.int32)
    col, row = q % W, q // W
    masks = []
    for k in NONCENTER_TAPS:
        dy, dx = k // 3 - 1, k % 3 - 1
        valid = ((col + dx >= 0) & (col + dx < W) &
                 (row + dy >= 0) & (row + dy < H)).astype(jnp.float32)
        masks.append(valid)
    m = jnp.stack(masks)[:, None, :]                 # (8, 1, HW)
    return jnp.tile(m, (1, Cc, B))                    # (8, Cc, B*HW)


def _num_grid_blocks(N):
    # v7x has 2 TensorCores per chip -> keep 2 grid blocks ("parallel").
    # v5e/v6e have 1 TC -> a single grid step (all images lane-folded) avoids
    # paying the per-step fixed overhead N times.
    try:
        dk = jax.devices()[0].device_kind.lower()
    except Exception:
        dk = ""
    g = 2 if ("v7" in dk or "7x" in dk) else 1
    return g if (g <= N and N % g == 0) else 1


def basic_stage(x_nchw, w1f, bshift, w2t, *, Cc):
    """Runs the whole BasicStage (all blocks, all images) in one pallas_call."""
    N, C, H, W = x_nchw.shape
    depth, hidden, Kf = w1f.shape
    HW = H * W

    G = _num_grid_blocks(N)                 # grid blocks (one per TensorCore)
    B = N // G                              # images lane-folded per block
    LW = B * HW

    # (G, C, B*HW): channel-major, batch folded into the lane axis (layout plumbing
    # done in the wrapper so the kernel sees lane-dense slabs).
    x_folded = x_nchw.reshape(G, B, C, HW).transpose(0, 2, 1, 3).reshape(G, C, LW)
    masks = _tap_masks(H, W, Cc, B)
    shifts = tuple((-((k // 3 - 1) * W + (k % 3 - 1))) % LW for k in NONCENTER_TAPS)

    # bf16 MXU operands (bf16-native MXUs on v5e/v6e/v7x); accumulation stays f32.
    w1f_b = w1f.astype(jnp.bfloat16)
    w2t_b = w2t.astype(jnp.bfloat16)

    flops = 2 * depth * (hidden * Kf + C * hidden) * (G * LW)
    bytes_accessed = (4 * (x_folded.size + G * C * LW + bshift.size + masks.size)
                      + 2 * (w1f_b.size + w2t_b.size))
    cost = pl.CostEstimate(flops=flops, transcendentals=0,
                           bytes_accessed=bytes_accessed)

    kernel = functools.partial(fused_stage_kernel, Cc=Cc, C=C, depth=depth,
                               shifts=shifts)
    out = pl.pallas_call(
        kernel,
        out_shape=jax.ShapeDtypeStruct((G, C, LW), jnp.float32),
        grid_spec=pltpu.PrefetchScalarGridSpec(
            num_scalar_prefetch=0,
            grid=(G,),
            in_specs=[
                pl.BlockSpec((1, C, LW), lambda g: (g, 0, 0)),
                # Constant index maps -> masks/weights stay VMEM-resident.
                pl.BlockSpec((8, Cc, LW), lambda g: (0, 0, 0)),
                pl.BlockSpec((depth, hidden, Kf), lambda g: (0, 0, 0)),
                pl.BlockSpec((depth, hidden, 1), lambda g: (0, 0, 0)),
                pl.BlockSpec((depth, C, hidden), lambda g: (0, 0, 0)),
            ],
            out_specs=pl.BlockSpec((1, C, LW), lambda g: (g, 0, 0)),
            scratch_shapes=[pltpu.VMEM((Kf, LW), jnp.float32)],
        ),
        compiler_params=pltpu.CompilerParams(
            dimension_semantics=("parallel",)),      # v7x: one block per TensorCore
        cost_estimate=cost,
    )(x_folded, masks, w1f_b, bshift, w2t_b)

    return (out.reshape(G, C, B, HW).transpose(0, 2, 1, 3).reshape(N, C, H, W))


# ---------------- parameter construction & algebraic folding -------------------
def init_block_params(key, dim, n_div, mlp_ratio):
    """Deterministic synthetic parameters for one MLPBlock (torch layouts)."""
    Cc = dim // n_div
    hidden = int(dim * mlp_ratio)
    ks = jax.random.split(key, 7)

    wc = 0.1 * jax.random.normal(ks[0], (Cc, Cc, 3, 3), jnp.float32)    # OIHW
    w1 = 0.1 * jax.random.normal(ks[1], (hidden, dim), jnp.float32)     # (out, in)
    gamma = 1.0 + 0.1 * jax.random.normal(ks[2], (hidden,), jnp.float32)
    beta = 0.1 * jax.random.normal(ks[3], (hidden,), jnp.float32)
    mean = 0.05 * jax.random.normal(ks[4], (hidden,), jnp.float32)
    var = jnp.abs(1.0 + 0.1 * jax.random.normal(ks[5], (hidden,), jnp.float32))
    w2 = 0.1 * jax.random.normal(ks[6], (dim, hidden), jnp.float32)     # (out, in)

    eps = 1e-5
    scale = gamma / jnp.sqrt(var + eps)
    shift = beta - mean * scale
    return dict(wc=wc, w1=w1, scale=scale, shift=shift, w2=w2)


def fold_block_params(p, dim, n_div):
    """Fold conv3x3 + BN scale into the first 1x1 conv, with columns ordered to
    match the kernel's im2col layout: [xt (dim cols) | 8 shifted taps]."""
    Cc = dim // n_div
    wc, w1, scale, shift, w2 = p["wc"], p["w1"], p["scale"], p["shift"], p["w2"]
    hidden = w1.shape[0]

    w1s = w1 * scale[:, None]                                   # BN scale folded
    # conv taps as (k, cin, cout); tap k -> (kh, kw) = (k//3, k%3)
    wc_k = jnp.transpose(wc, (2, 3, 1, 0)).reshape(9, Cc, Cc)
    # A[h, k, ci] = sum_co w1s[h, co] * wc[co, ci, kh, kw]
    A = jnp.einsum("kic,hc->hki", wc_k, w1s[:, :Cc])            # (hidden, 9, Cc)
    center = A[:, 4, :]                                         # unshifted tap
    others = A[:, list(NONCENTER_TAPS), :].reshape(hidden, 8 * Cc)
    # columns: [center tap over x1 | untouched x2 | 8 shifted taps]
    w1_fold = jnp.concatenate([center, w1s[:, Cc:], others], axis=1)  # (hidden, dim+8*Cc)
    return w1_fold, shift.reshape(hidden, 1), w2                 # w2 already (dim, hidden)


# ---------------- pure-JAX reference (unfused, NCHW) ---------------------------
def ref_mlp_block(x, p, Cc):
    x1 = x[:, :Cc]
    y1 = jax.lax.conv_general_dilated(
        x1, p["wc"], window_strides=(1, 1), padding="SAME",
        dimension_numbers=("NCHW", "OIHW", "NCHW"))
    xm = jnp.concatenate([y1, x[:, Cc:]], axis=1)
    h = jnp.einsum("nchw,dc->ndhw", xm, p["w1"])
    h = h * p["scale"][None, :, None, None] + p["shift"][None, :, None, None]
    h = jnp.maximum(h, 0.0)
    y = jnp.einsum("ndhw,cd->nchw", h, p["w2"])
    return x + y


if __name__ == "__main__":
    dim, depth, n_div, mlp_ratio = 16, 2, 4, 2.0
    N, H, W = 2, 16, 16
    Cc = dim // n_div

    key = jax.random.PRNGKey(0)
    kx, kp = jax.random.split(key)
    x = jax.random.normal(kx, (N, dim, H, W), jnp.float32)   # PyTorch-style NCHW

    params = [init_block_params(jax.random.fold_in(kp, i), dim, n_div, mlp_ratio)
              for i in range(depth)]
    folded = [fold_block_params(p, dim, n_div) for p in params]
    w1f = jnp.stack([f[0] for f in folded])      # (depth, hidden, dim + 8*Cc)
    bsh = jnp.stack([f[1] for f in folded])      # (depth, hidden, 1)
    w2t = jnp.stack([f[2] for f in folded])      # (depth, dim, hidden)

    out = basic_stage(x, w1f, bsh, w2t, Cc=Cc)
    out = jax.block_until_ready(out)

    ref = x
    for p in params:
        ref = ref_mlp_block(ref, p, Cc)
    # bf16 MXU operands with f32 accumulation -> tolerance relaxed from the f32
    # 1e-3 gate; a structural bug (wrong tap/shift/mask) would be O(0.1-1).
    assert jnp.allclose(out, ref, atol=1e-2, rtol=1e-2), "mismatch vs reference"

    print("KERNEL_OK")
</pallas_src>

<mosaic_0001>
module attributes {stable_mosaic.version = 11 : i64} {
  func.func @fused_stage_kernel(%arg0: i32, %arg1: memref<1x16x512xf32, #tpu.memory_space<vmem>>, %arg2: memref<8x4x512xf32, #tpu.memory_space<vmem>>, %arg3: memref<2x32x48xbf16, #tpu.memory_space<vmem>>, %arg4: memref<2x32x1xf32, #tpu.memory_space<vmem>>, %arg5: memref<2x16x32xbf16, #tpu.memory_space<vmem>>, %arg6: memref<1x16x512xf32, #tpu.memory_space<vmem>>, %arg7: memref<48x512xf32, #tpu.memory_space<vmem>>) attributes {dimension_semantics = [#tpu.dimension_semantics<parallel>], iteration_bounds = array<i64: 1>, scalar_prefetch = 0 : i64, scratch_operands = 1 : i64, tpu.core_type = #tpu.core_type<tc>, window_params = [{transform_indices = @transform_0, window_bounds = array<i64: 1, 16, 512>}, {pipeline_mode = #tpu.pipeline_mode<synchronous>, transform_indices = @transform_1, window_bounds = array<i64: 8, 4, 512>}, {pipeline_mode = #tpu.pipeline_mode<synchronous>, transform_indices = @transform_2, window_bounds = array<i64: 2, 32, 48>}, {pipeline_mode = #tpu.pipeline_mode<synchronous>, transform_indices = @transform_3, window_bounds = array<i64: 2, 32, 1>}, {pipeline_mode = #tpu.pipeline_mode<synchronous>, transform_indices = @transform_4, window_bounds = array<i64: 2, 16, 32>}, {transform_indices = @transform_5, window_bounds = array<i64: 1, 16, 512>}]} {
    %c0 = arith.constant 0 : index
    %c0_0 = arith.constant 0 : index
    %c0_1 = arith.constant 0 : index
    %0 = vector.load %arg1[%c0, %c0_0, %c0_1] : memref<1x16x512xf32, #tpu.memory_space<vmem>>, vector<1x16x512xf32>
    %1 = vector.shape_cast %0 : vector<1x16x512xf32> to vector<16x512xf32>
    %2 = vector.extract_strided_slice %1 {offsets = [0, 0], sizes = [4, 512], strides = [1, 1]} : vector<16x512xf32> to vector<4x512xf32>
    %c0_2 = arith.constant 0 : index
    %c0_3 = arith.constant 0 : index
    %3 = vector.load %arg7[%c0_2, %c0_3] : memref<48x512xf32, #tpu.memory_space<vmem>>, vector<16x512xf32>
    tpu.vector_store %arg7[%c0_2, %c0_3], %1 {strides = array<i32>} : memref<48x512xf32, #tpu.memory_space<vmem>>, vector<16x512xf32>,
    %c17_i32 = arith.constant 17 : i32
    %4 = tpu.dynamic_rotate %2 by %c17_i32 dim 1 : vector<4x512xf32>, i32 -> vector<4x512xf32>
    %c0_4 = arith.constant 0 : index
    %c0_5 = arith.constant 0 : index
    %c0_6 = arith.constant 0 : index
    %5 = vector.load %arg2[%c0_4, %c0_5, %c0_6] : memref<8x4x512xf32, #tpu.memory_space<vmem>>, vector<1x4x512xf32>
    %6 = vector.shape_cast %5 : vector<1x4x512xf32> to vector<4x512xf32>
    %7 = arith.mulf %4, %6 : vector<4x512xf32>
    %c16 = arith.constant 16 : index
    %c0_7 = arith.constant 0 : index
    %8 = vector.load %arg7[%c16, %c0_7] : memref<48x512xf32, #tpu.memory_space<vmem>>, vector<4x512xf32>
    tpu.vector_store %arg7[%c16, %c0_7], %7 {strides = array<i32>} : memref<48x512xf32, #tpu.memory_space<vmem>>, vector<4x512xf32>,
    %c16_i32 = arith.constant 16 : i32
    %9 = tpu.dynamic_rotate %2 by %c16_i32 dim 1 : vector<4x512xf32>, i32 -> vector<4x512xf32>
    %c1 = arith.constant 1 : index
    %c0_8 = arith.constant 0 : index
    %c0_9 = arith.constant 0 : index
    %10 = vector.load %arg2[%c1, %c0_8, %c0_9] : memref<8x4x512xf32, #tpu.memory_space<vmem>>, vector<1x4x512xf32>
    %11 = vector.shape_cast %10 : vector<1x4x512xf32> to vector<4x512xf32>
    %12 = arith.mulf %9, %11 : vector<4x512xf32>
    %c20 = arith.constant 20 : index
    %c0_10 = arith.constant 0 : index
    %13 = vector.load %arg7[%c20, %c0_10] : memref<48x512xf32, #tpu.memory_space<vmem>>, vector<4x512xf32>
    tpu.vector_store %arg7[%c20, %c0_10], %12 {strides = array<i32>} : memref<48x512xf32, #tpu.memory_space<vmem>>, vector<4x512xf32>,
    %c15_i32 = arith.constant 15 : i32
    %14 = tpu.dynamic_rotate %2 by %c15_i32 dim 1 : vector<4x512xf32>, i32 -> vector<4x512xf32>
    %c2 = arith.constant 2 : index
    %c0_11 = arith.constant 0 : index
    %c0_12 = arith.constant 0 : index
    %15 = vector.load %arg2[%c2, %c0_11, %c0_12] : memref<8x4x512xf32, #tpu.memory_space<vmem>>, vector<1x4x512xf32>
    %16 = vector.shape_cast %15 : vector<1x4x512xf32> to vector<4x512xf32>
    %17 = arith.mulf %14, %16 : vector<4x512xf32>
    %c24 = arith.constant 24 : index
    %c0_13 = arith.constant 0 : index
    %18 = vector.load %arg7[%c24, %c0_13] : memref<48x512xf32, #tpu.memory_space<vmem>>, vector<4x512xf32>
    tpu.vector_store %arg7[%c24, %c0_13], %17 {strides = array<i32>} : memref<48x512xf32, #tpu.memory_space<vmem>>, vector<4x512xf32>,
    %c1_i32 = arith.constant 1 : i32
    %19 = tpu.dynamic_rotate %2 by %c1_i32 dim 1 : vector<4x512xf32>, i32 -> vector<4x512xf32>
    %c3 = arith.constant 3 : index
    %c0_14 = arith.constant 0 : index
    %c0_15 = arith.constant 0 : index
    %20 = vector.load %arg2[%c3, %c0_14, %c0_15] : memref<8x4x512xf32, #tpu.memory_space<vmem>>, vector<1x4x512xf32>
    %21 = vector.shape_cast %20 : vector<1x4x512xf32> to vector<4x512xf32>
    %22 = arith.mulf %19, %21 : vector<4x512xf32>
    %c28 = arith.constant 28 : index
    %c0_16 = arith.constant 0 : index
    %23 = vector.load %arg7[%c28, %c0_16] : memref<48x512xf32, #tpu.memory_space<vmem>>, vector<4x512xf32>
    tpu.vector_store %arg7[%c28, %c0_16], %22 {strides = array<i32>} : memref<48x512xf32, #tpu.memory_space<vmem>>, vector<4x512xf32>,
    %c511_i32 = arith.constant 511 : i32
    %24 = tpu.dynamic_rotate %2 by %c511_i32 dim 1 : vector<4x512xf32>, i32 -> vector<4x512xf32>
    %c4 = arith.constant 4 : index
    %c0_17 = arith.constant 0 : index
    %c0_18 = arith.constant 0 : index
    %25 = vector.load %arg2[%c4, %c0_17, %c0_18] : memref<8x4x512xf32, #tpu.memory_space<vmem>>, vector<1x4x512xf32>
    %26 = vector.shape_cast %25 : vector<1x4x512xf32> to vector<4x512xf32>
    %27 = arith.mulf %24, %26 : vector<4x512xf32>
    %c32 = arith.constant 32 : index
    %c0_19 = arith.constant 0 : index
    %28 = vector.load %arg7[%c32, %c0_19] : memref<48x512xf32, #tpu.memory_space<vmem>>, vector<4x512xf32>
    tpu.vector_store %arg7[%c32, %c0_19], %27 {strides = array<i32>} : memref<48x512xf32, #tpu.memory_space<vmem>>, vector<4x512xf32>,
    %c497_i32 = arith.constant 497 : i32
    %29 = tpu.dynamic_rotate %2 by %c497_i32 dim 1 : vector<4x512xf32>, i32 -> vector<4x512xf32>
    %c5 = arith.constant 5 : index
    %c0_20 = arith.constant 0 : index
    %c0_21 = arith.constant 0 : index
    %30 = vector.load %arg2[%c5, %c0_20, %c0_21] : memref<8x4x512xf32, #tpu.memory_space<vmem>>, vector<1x4x512xf32>
    %31 = vector.shape_cast %30 : vector<1x4x512xf32> to vector<4x512xf32>
    %32 = arith.mulf %29, %31 : vector<4x512xf32>
    %c36 = arith.constant 36 : index
    %c0_22 = arith.constant 0 : index
    %33 = vector.load %arg7[%c36, %c0_22] : memref<48x512xf32, #tpu.memory_space<vmem>>, vector<4x512xf32>
    tpu.vector_store %arg7[%c36, %c0_22], %32 {strides = array<i32>} : memref<48x512xf32, #tpu.memory_space<vmem>>, vector<4x512xf32>,
    %c496_i32 = arith.constant 496 : i32
    %34 = tpu.dynamic_rotate %2 by %c496_i32 dim 1 : vector<4x512xf32>, i32 -> vector<4x512xf32>
    %c6 = arith.constant 6 : index
    %c0_23 = arith.constant 0 : index
    %c0_24 = arith.constant 0 : index
    %35 = vector.load %arg2[%c6, %c0_23, %c0_24] : memref<8x4x512xf32, #tpu.memory_space<vmem>>, vector<1x4x512xf32>
    %36 = vector.shape_cast %35 : vector<1x4x512xf32> to vector<4x512xf32>
    %37 = arith.mulf %34, %36 : vector<4x512xf32>
    %c40 = arith.constant 40 : index
    %c0_25 = arith.constant 0 : index
    %38 = vector.load %arg7[%c40, %c0_25] : memref<48x512xf32, #tpu.memory_space<vmem>>, vector<4x512xf32>
    tpu.vector_store %arg7[%c40, %c0_25], %37 {strides = array<i32>} : memref<48x512xf32, #tpu.memory_space<vmem>>, vector<4x512xf32>,
    %c495_i32 = arith.constant 495 : i32
    %39 = tpu.dynamic_rotate %2 by %c495_i32 dim 1 : vector<4x512xf32>, i32 -> vector<4x512xf32>
    %c7 = arith.constant 7 : index
    %c0_26 = arith.constant 0 : index
    %c0_27 = arith.constant 0 : index
    %40 = vector.load %arg2[%c7, %c0_26, %c0_27] : memref<8x4x512xf32, #tpu.memory_space<vmem>>, vector<1x4x512xf32>
    %41 = vector.shape_cast %40 : vector<1x4x512xf32> to vector<4x512xf32>
    %42 = arith.mulf %39, %41 : vector<4x512xf32>
    %c44 = arith.constant 44 : index
    %c0_28 = arith.constant 0 : index
    %43 = vector.load %arg7[%c44, %c0_28] : memref<48x512xf32, #tpu.memory_space<vmem>>, vector<4x512xf32>
    tpu.vector_store %arg7[%c44, %c0_28], %42 {strides = array<i32>} : memref<48x512xf32, #tpu.memory_space<vmem>>, vector<4x512xf32>,
    %c0_29 = arith.constant 0 : index
    %c0_30 = arith.constant 0 : index
    %c0_31 = arith.constant 0 : index
    %44 = vector.load %arg3[%c0_29, %c0_30, %c0_31] : memref<2x32x48xbf16, #tpu.memory_space<vmem>>, vector<1x32x48xbf16>
    %45 = vector.shape_cast %44 : vector<1x32x48xbf16> to vector<32x48xbf16>
    %c0_32 = arith.constant 0 : index
    %c0_33 = arith.constant 0 : index
    %46 = vector.load %arg7[%c0_32, %c0_33] : memref<48x512xf32, #tpu.memory_space<vmem>>, vector<48x512xf32>
    %47 = arith.truncf %46 : vector<48x512xf32> to vector<48x512xbf16>
    %cst = arith.constant dense<0.000000e+00> : vector<32x512xf32>
    %48 = tpu.matmul %45, %47, %cst {dimension_numbers = #tpu.dot_dimension_numbers<[1], [0], [0], [1], [0, 0, 1, 1], [], []>} : vector<32x48xbf16>, vector<48x512xbf16>, vector<32x512xf32> -> vector<32x512xf32>
    %c0_34 = arith.constant 0 : index
    %c0_35 = arith.constant 0 : index
    %c0_36 = arith.constant 0 : index
    %49 = vector.load %arg4[%c0_34, %c0_35, %c0_36] : memref<2x32x1xf32, #tpu.memory_space<vmem>>, vector<1x32x1xf32>
    %50 = vector.shape_cast %49 : vector<1x32x1xf32> to vector<32x1xf32>
    %51 = vector.broadcast %50 : vector<32x1xf32> to vector<32x512xf32>
    %52 = arith.addf %48, %51 : vector<32x512xf32>
    %cst_37 = arith.constant 0.000000e+00 : f32
    %53 = vector.broadcast %cst_37 : f32 to vector<32x512xf32>
    %54 = arith.maximumf %52, %53 : vector<32x512xf32>
    %c0_38 = arith.constant 0 : index
    %c0_39 = arith.constant 0 : index
    %c0_40 = arith.constant 0 : index
    %55 = vector.load %arg5[%c0_38, %c0_39, %c0_40] : memref<2x16x32xbf16, #tpu.memory_space<vmem>>, vector<1x16x32xbf16>
    %56 = vector.shape_cast %55 : vector<1x16x32xbf16> to vector<16x32xbf16>
    %57 = arith.truncf %54 : vector<32x512xf32> to vector<32x512xbf16>
    %cst_41 = arith.constant dense<0.000000e+00> : vector<16x512xf32>
    %58 = tpu.matmul %56, %57, %cst_41 {dimension_numbers = #tpu.dot_dimension_numbers<[1], [0], [0], [1], [0, 0, 1, 1], [], []>} : vector<16x32xbf16>, vector<32x512xbf16>, vector<16x512xf32> -> vector<16x512xf32>
    %59 = arith.addf %1, %58 : vector<16x512xf32>
    %60 = vector.extract_strided_slice %59 {offsets = [0, 0], sizes = [4, 512], strides = [1, 1]} : vector<16x512xf32> to vector<4x512xf32>
    %c0_42 = arith.constant 0 : index
    %c0_43 = arith.constant 0 : index
    %61 = vector.load %arg7[%c0_42, %c0_43] : memref<48x512xf32, #tpu.memory_space<vmem>>, vector<16x512xf32>
    tpu.vector_store %arg7[%c0_42, %c0_43], %59 {strides = array<i32>} : memref<48x512xf32, #tpu.memory_space<vmem>>, vector<16x512xf32>,
    %c17_i32_44 = arith.constant 17 : i32
    %62 = tpu.dynamic_rotate %60 by %c17_i32_44 dim 1 : vector<4x512xf32>, i32 -> vector<4x512xf32>
    %c0_45 = arith.constant 0 : index
    %c0_46 = arith.constant 0 : index
    %c0_47 = arith.constant 0 : index
    %63 = vector.load %arg2[%c0_45, %c0_46, %c0_47] : memref<8x4x512xf32, #tpu.memory_space<vmem>>, vector<1x4x512xf32>
    %64 = vector.shape_cast %63 : vector<1x4x512xf32> to vector<4x512xf32>
    %65 = arith.mulf %62, %64 : vector<4x512xf32>
    %c16_48 = arith.constant 16 : index
    %c0_49 = arith.constant 0 : index
    %66 = vector.load %arg7[%c16_48, %c0_49] : memref<48x512xf32, #tpu.memory_space<vmem>>, vector<4x512xf32>
    tpu.vector_store %arg7[%c16_48, %c0_49], %65 {strides = array<i32>} : memref<48x512xf32, #tpu.memory_space<vmem>>, vector<4x512xf32>,
    %c16_i32_50 = arith.constant 16 : i32
    %67 = tpu.dynamic_rotate %60 by %c16_i32_50 dim 1 : vector<4x512xf32>, i32 -> vector<4x512xf32>
    %c1_51 = arith.constant 1 : index
    %c0_52 = arith.constant 0 : index
    %c0_53 = arith.constant 0 : index
    %68 = vector.load %arg2[%c1_51, %c0_52, %c0_53] : memref<8x4x512xf32, #tpu.memory_space<vmem>>, vector<1x4x512xf32>
    %69 = vector.shape_cast %68 : vector<1x4x512xf32> to vector<4x512xf32>
    %70 = arith.mulf %67, %69 : vector<4x512xf32>
    %c20_54 = arith.constant 20 : index
    %c0_55 = arith.constant 0 : index
    %71 = vector.load %arg7[%c20_54, %c0_55] : memref<48x512xf32, #tpu.memory_space<vmem>>, vector<4x512xf32>
    tpu.vector_store %arg7[%c20_54, %c0_55], %70 {strides = array<i32>} : memref<48x512xf32, #tpu.memory_space<vmem>>, vector<4x512xf32>,
    %c15_i32_56 = arith.constant 15 : i32
    %72 = tpu.dynamic_rotate %60 by %c15_i32_56 dim 1 : vector<4x512xf32>, i32 -> vector<4x512xf32>
    %c2_57 = arith.constant 2 : index
    %c0_58 = arith.constant 0 : index
    %c0_59 = arith.constant 0 : index
    %73 = vector.load %arg2[%c2_57, %c0_58, %c0_59] : memref<8x4x512xf32, #tpu.memory_space<vmem>>, vector<1x4x512xf32>
    %74 = vector.shape_cast %73 : vector<1x4x512xf32> to vector<4x512xf32>
    %75 = arith.mulf %72, %74 : vector<4x512xf32>
    %c24_60 = arith.constant 24 : index
    %c0_61 = arith.constant 0 : index
    %76 = vector.load %arg7[%c24_60, %c0_61] : memref<48x512xf32, #tpu.memory_space<vmem>>, vector<4x512xf32>
    tpu.vector_store %arg7[%c24_60, %c0_61], %75 {strides = array<i32>} : memref<48x512xf32, #tpu.memory_space<vmem>>, vector<4x512xf32>,
    %c1_i32_62 = arith.constant 1 : i32
    %77 = tpu.dynamic_rotate %60 by %c1_i32_62 dim 1 : vector<4x512xf32>, i32 -> vector<4x512xf32>
    %c3_63 = arith.constant 3 : index
    %c0_64 = arith.constant 0 : index
    %c0_65 = arith.constant 0 : index
    %78 = vector.load %arg2[%c3_63, %c0_64, %c0_65] : memref<8x4x512xf32, #tpu.memory_space<vmem>>, vector<1x4x512xf32>
    %79 = vector.shape_cast %78 : vector<1x4x512xf32> to vector<4x512xf32>
    %80 = arith.mulf %77, %79 : vector<4x512xf32>
    %c28_66 = arith.constant 28 : index
    %c0_67 = arith.constant 0 : index
    %81 = vector.load %arg7[%c28_66, %c0_67] : memref<48x512xf32, #tpu.memory_space<vmem>>, vector<4x512xf32>
    tpu.vector_store %arg7[%c28_66, %c0_67], %80 {strides = array<i32>} : memref<48x512xf32, #tpu.memory_space<vmem>>, vector<4x512xf32>,
    %c511_i32_68 = arith.constant 511 : i32
    %82 = tpu.dynamic_rotate %60 by %c511_i32_68 dim 1 : vector<4x512xf32>, i32 -> vector<4x512xf32>
    %c4_69 = arith.constant 4 : index
    %c0_70 = arith.constant 0 : index
    %c0_71 = arith.constant 0 : index
    %83 = vector.load %arg2[%c4_69, %c0_70, %c0_71] : memref<8x4x512xf32, #tpu.memory_space<vmem>>, vector<1x4x512xf32>
    %84 = vector.shape_cast %83 : vector<1x4x512xf32> to vector<4x512xf32>
    %85 = arith.mulf %82, %84 : vector<4x512xf32>
    %c32_72 = arith.constant 32 : index
    %c0_73 = arith.constant 0 : index
    %86 = vector.load %arg7[%c32_72, %c0_73] : memref<48x512xf32, #tpu.memory_space<vmem>>, vector<4x512xf32>
    tpu.vector_store %arg7[%c32_72, %c0_73], %85 {strides = array<i32>} : memref<48x512xf32, #tpu.memory_space<vmem>>, vector<4x512xf32>,
    %c497_i32_74 = arith.constant 497 : i32
    %87 = tpu.dynamic_rotate %60 by %c497_i32_74 dim 1 : vector<4x512xf32>, i32 -> vector<4x512xf32>
    %c5_75 = arith.constant 5 : index
    %c0_76 = arith.constant 0 : index
    %c0_77 = arith.constant 0 : index
    %88 = vector.load %arg2[%c5_75, %c0_76, %c0_77] : memref<8x4x512xf32, #tpu.memory_space<vmem>>, vector<1x4x512xf32>
    %89 = vector.shape_cast %88 : vector<1x4x512xf32> to vector<4x512xf32>
    %90 = arith.mulf %87, %89 : vector<4x512xf32>
    %c36_78 = arith.constant 36 : index
    %c0_79 = arith.constant 0 : index
    %91 = vector.load %arg7[%c36_78, %c0_79] : memref<48x512xf32, #tpu.memory_space<vmem>>, vector<4x512xf32>
    tpu.vector_store %arg7[%c36_78, %c0_79], %90 {strides = array<i32>} : memref<48x512xf32, #tpu.memory_space<vmem>>, vector<4x512xf32>,
    %c496_i32_80 = arith.constant 496 : i32
    %92 = tpu.dynamic_rotate %60 by %c496_i32_80 dim 1 : vector<4x512xf32>, i32 -> vector<4x512xf32>
    %c6_81 = arith.constant 6 : index
    %c0_82 = arith.constant 0 : index
    %c0_83 = arith.constant 0 : index
    %93 = vector.load %arg2[%c6_81, %c0_82, %c0_83] : memref<8x4x512xf32, #tpu.memory_space<vmem>>, vector<1x4x512xf32>
    %94 = vector.shape_cast %93 : vector<1x4x512xf32> to vector<4x512xf32>
    %95 = arith.mulf %92, %94 : vector<4x512xf32>
    %c40_84 = arith.constant 40 : index
    %c0_85 = arith.constant 0 : index
    %96 = vector.load %arg7[%c40_84, %c0_85] : memref<48x512xf32, #tpu.memory_space<vmem>>, vector<4x512xf32>
    tpu.vector_store %arg7[%c40_84, %c0_85], %95 {strides = array<i32>} : memref<48x512xf32, #tpu.memory_space<vmem>>, vector<4x512xf32>,
    %c495_i32_86 = arith.constant 495 : i32
    %97 = tpu.dynamic_rotate %60 by %c495_i32_86 dim 1 : vector<4x512xf32>, i32 -> vector<4x512xf32>
    %c7_87 = arith.constant 7 : index
    %c0_88 = arith.constant 0 : index
    %c0_89 = arith.constant 0 : index
    %98 = vector.load %arg2[%c7_87, %c0_88, %c0_89] : memref<8x4x512xf32, #tpu.memory_space<vmem>>, vector<1x4x512xf32>
    %99 = vector.shape_cast %98 : vector<1x4x512xf32> to vector<4x512xf32>
    %100 = arith.mulf %97, %99 : vector<4x512xf32>
    %c44_90 = arith.constant 44 : index
    %c0_91 = arith.constant 0 : index
    %101 = vector.load %arg7[%c44_90, %c0_91] : memref<48x512xf32, #tpu.memory_space<vmem>>, vector<4x512xf32>
    tpu.vector_store %arg7[%c44_90, %c0_91], %100 {strides = array<i32>} : memref<48x512xf32, #tpu.memory_space<vmem>>, vector<4x512xf32>,
    %c1_92 = arith.constant 1 : index
    %c0_93 = arith.constant 0 : index
    %c0_94 = arith.constant 0 : index
    %102 = vector.load %arg3[%c1_92, %c0_93, %c0_94] : memref<2x32x48xbf16, #tpu.memory_space<vmem>>, vector<1x32x48xbf16>
    %103 = vector.shape_cast %102 : vector<1x32x48xbf16> to vector<32x48xbf16>
    %c0_95 = arith.constant 0 : index
    %c0_96 = arith.constant 0 : index
    %104 = vector.load %arg7[%c0_95, %c0_96] : memref<48x512xf32, #tpu.memory_space<vmem>>, vector<48x512xf32>
    %105 = arith.truncf %104 : vector<48x512xf32> to vector<48x512xbf16>
    %cst_97 = arith.constant dense<0.000000e+00> : vector<32x512xf32>
    %106 = tpu.matmul %103, %105, %cst_97 {dimension_numbers = #tpu.dot_dimension_numbers<[1], [0], [0], [1], [0, 0, 1, 1], [], []>} : vector<32x48xbf16>, vector<48x512xbf16>, vector<32x512xf32> -> vector<32x512xf32>
    %c1_98 = arith.constant 1 : index
    %c0_99 = arith.constant 0 : index
    %c0_100 = arith.constant 0 : index
    %107 = vector.load %arg4[%c1_98, %c0_99, %c0_100] : memref<2x32x1xf32, #tpu.memory_space<vmem>>, vector<1x32x1xf32>
    %108 = vector.shape_cast %107 : vector<1x32x1xf32> to vector<32x1xf32>
    %109 = vector.broadcast %108 : vector<32x1xf32> to vector<32x512xf32>
    %110 = arith.addf %106, %109 : vector<32x512xf32>
    %cst_101 = arith.constant 0.000000e+00 : f32
    %111 = vector.broadcast %cst_101 : f32 to vector<32x512xf32>
    %112 = arith.maximumf %110, %111 : vector<32x512xf32>
    %c1_102 = arith.constant 1 : index
    %c0_103 = arith.constant 0 : index
    %c0_104 = arith.constant 0 : index
    %113 = vector.load %arg5[%c1_102, %c0_103, %c0_104] : memref<2x16x32xbf16, #tpu.memory_space<vmem>>, vector<1x16x32xbf16>
    %114 = vector.shape_cast %113 : vector<1x16x32xbf16> to vector<16x32xbf16>
    %115 = arith.truncf %112 : vector<32x512xf32> to vector<32x512xbf16>
    %cst_105 = arith.constant dense<0.000000e+00> : vector<16x512xf32>
    %116 = tpu.matmul %114, %115, %cst_105 {dimension_numbers = #tpu.dot_dimension_numbers<[1], [0], [0], [1], [0, 0, 1, 1], [], []>} : vector<16x32xbf16>, vector<32x512xbf16>, vector<16x512xf32> -> vector<16x512xf32>
    %117 = arith.addf %59, %116 : vector<16x512xf32>
    %c0_106 = arith.constant 0 : index
    %c0_107 = arith.constant 0 : index
    %c0_108 = arith.constant 0 : index
    %118 = vector.load %arg6[%c0_106, %c0_107, %c0_108] : memref<1x16x512xf32, #tpu.memory_space<vmem>>, vector<1x16x512xf32>
    %119 = vector.shape_cast %118 : vector<1x16x512xf32> to vector<16x512xf32>
    %120 = vector.shape_cast %117 : vector<16x512xf32> to vector<1x16x512xf32>
    tpu.vector_store %arg6[%c0_106, %c0_107, %c0_108], %120 {strides = array<i32>} : memref<1x16x512xf32, #tpu.memory_space<vmem>>, vector<1x16x512xf32>,
    return
  }
  func.func @transform_0(%arg0: i32) -> (i32, i32, i32) {
    %c0_i32 = arith.constant 0 : i32
    %c0_i32_0 = arith.constant 0 : i32
    %c0_i32_1 = arith.constant 0 : i32
    return %arg0, %c0_i32, %c0_i32_0 : i32, i32, i32
  }
  func.func @transform_1(%arg0: i32) -> (i32, i32, i32) {
    %c0_i32 = arith.constant 0 : i32
    %c0_i32_0 = arith.constant 0 : i32
    %c0_i32_1 = arith.constant 0 : i32
    %c0_i32_2 = arith.constant 0 : i32
    return %c0_i32, %c0_i32_0, %c0_i32_1 : i32, i32, i32
  }
  func.func @transform_2(%arg0: i32) -> (i32, i32, i32) {
    %c0_i32 = arith.constant 0 : i32
    %c0_i32_0 = arith.constant 0 : i32
    %c0_i32_1 = arith.constant 0 : i32
    %c0_i32_2 = arith.constant 0 : i32
    return %c0_i32, %c0_i32_0, %c0_i32_1 : i32, i32, i32
  }
  func.func @transform_3(%arg0: i32) -> (i32, i32, i32) {
    %c0_i32 = arith.constant 0 : i32
    %c0_i32_0 = arith.constant 0 : i32
    %c0_i32_1 = arith.constant 0 : i32
    %c0_i32_2 = arith.constant 0 : i32
    return %c0_i32, %c0_i32_0, %c0_i32_1 : i32, i32, i32
  }
  func.func @transform_4(%arg0: i32) -> (i32, i32, i32) {
    %c0_i32 = arith.constant 0 : i32
    %c0_i32_0 = arith.constant 0 : i32
    %c0_i32_1 = arith.constant 0 : i32
    %c0_i32_2 = arith.constant 0 : i32
    return %c0_i32, %c0_i32_0, %c0_i32_1 : i32, i32, i32
  }
  func.func @transform_5(%arg0: i32) -> (i32, i32, i32) {
    %c0_i32 = arith.constant 0 : i32
    %c0_i32_0 = arith.constant 0 : i32
    %c0_i32_1 = arith.constant 0 : i32
    return %arg0, %c0_i32, %c0_i32_0 : i32, i32, i32
  }
}

</mosaic_0001>

<bundles_post_ra>
// kernel: tpu_custom_call.1
= control target key start
LH: loop header
LB: loop body
LE: loop exit
PB: predicated region body
PF: predicated region fallthrough
CT: control target
= control target key end

     0   :  { %10 = vsyncpa [#allocation4], 0  ;;  %s2260_s0 = inlined_call_operand.vmem [shape: f32[1,16,512], index: 0, kind: input, shape index: {}]   ;;  %s2261_s1 = inlined_call_operand.hbm [shape: f32[8,4,512], index: 1, kind: input, shape index: {}]   ;;  %s2262_s2 = inlined_call_operand.hbm [shape: bf16[2,32,48], index: 2, kind: input, shape index: {}]   ;;  %s2263_s3 = inlined_call_operand.vmem [shape: f32[2,32,1], index: 3, kind: input, shape index: {}]   ;;  %s2264_s4 = inlined_call_operand.hbm [shape: bf16[2,16,32], index: 4, kind: input, shape index: {}]   ;;  %s2265_s5 = inlined_call_operand.hbm [shape: f32[1,16,512], index: 5, kind: output, shape index: {}]  }
   0x1   :  { %11 = vsyncpa [#allocation7], 0  ;;  %s32_s20 = sshll.u32 %s2262_s2, 4  ;;  %s33_s20 = int_to_ptr.hbm [resolvable:$true] %s32_s20 }
   0x2   :  { %12 = vsyncpa [#allocation5], 0  ;;  %s1488_s21 = smov [#allocation6]   ;;  %s19_s25 = sshll.u32 %s2261_s1, 4  ;;  %s20_s25 = int_to_ptr.hbm [resolvable:$true] %s19_s25 }
   0x3   :  { %s34_s22 = sshll.u32 %s1488_s21, 4  ;;  %s1489_s26 = smov 64   ;;  %s35_s22 = int_to_ptr.vmem [resolvable:$true] %s34_s22 }
   0x4   :  { %s1490_s27 = smov 4   ;;  %s1491_s28 = smov [#allocation3]  }
   0x5   :  { %40 = dma.hbm_to_vmem [thread:$0]  %s33_s20, 512, %s35_s22, [#allocation7], %s1489_s26, %s1489_s26, %s1490_s27  }
   0x6   :  { %s21_s29 = sshll.u32 %s1491_s28, 4  ;;  %s1492_s30 = smov 256   ;;  %s22_s29 = int_to_ptr.vmem [resolvable:$true] %s21_s29 }
   0x7   :  { %s1493_s6 = smov 16   ;;  %s47_s8 = sshll.u32 %s2264_s4, 4  ;;  %s48_s8 = int_to_ptr.hbm [resolvable:$true] %s47_s8 }
   0x8   :  { %27 = dma.hbm_to_vmem [thread:$0]  %s20_s25, 2048, %s22_s29, [#allocation4], %s1492_s30, %s1492_s30, %s1493_s6  }
   0x9   :  { %s1494_s9 = smov [#allocation8]  }
   0xa   :  { %s49_s10 = sshll.u32 %s1494_s9, 4  ;;  %s50_s10 = int_to_ptr.vmem [resolvable:$true] %s49_s10 }
   0xb   :  { %55 = dma.hbm_to_vmem [thread:$0]  %s48_s8, 256, %s50_s10, [#allocation7], %s1489_s26, %s1489_s26, %s1490_s27  }
   0xc   :  { %1482 = dma.done.wait [#allocation4], 2048  }
   0xd   :  { %1483 = vsyncadd [#allocation4], 4294965248 }
   0xe   :  { %1484 = dma.done.wait [#allocation7], 768  }
   0xf   :  { %1485 = vsyncadd [#allocation7], 4294966528  ;;  %v1549_v0 = vld [vmem:[%s2260_s0 + $0x18] sm:$0xff]  ;;  %v1554_v1 = vld [vmem:[%s2260_s0 + $0x10] sm:$0xff]  ;;  %s1495_s15 = smov 113   ;;  %s1496_s16 = smov 111   ;;  %v93_v28 = vlaneseq }
  0x10   :  { %v1559_v2 = vld [vmem:[%s2260_s0] sm:$0xff]  ;;  %301 = vrot.lane.b32.xlu1 %v1549_v0, %s1495_s15  ;;  %385 = vrot.lane.b32.xlu2 %v1554_v1, %s1496_s16  ;;  %s1497_s17 = smov 127   ;;  %s1498_s18 = smov 112   ;;  %v101_v3 = vld [vmem:[#allocation3 + $0x8] sm:$0xff]  ;;  %v1588_v4 = vld [vmem:[%s2260_s0 + $0x8] sm:$0xff]  ;;  %vm504_vm8 = vcmask 392192  }
  0x11   :  { %295 = vrot.lane.b32.xlu0 %v1559_v2, %s1495_s15  ;;  %106 = vst [vmem:[#allocation1 + $0x10] ss:$2 sm:$0xff] %v101_v3  ;;  %v1600_v7 = vld [vmem:[#allocation3 + $0x18] sm:$0xff]  ;;  %s1499_s21 = smov 1   ;;  %v1609_v8 = vld [vmem:[#allocation3 + $0x28] sm:$0xff]  ;;  %s1500_s22 = smov 17  }
  0x12   :  { %v1622_v11 = vld [vmem:[#allocation3 + $0x38] sm:$0xff]  ;;  %s1501_s23 = smov 15   ;;  %v1635_v14 = vld [vmem:[#allocation3 + $0x48] sm:$0xff]  ;;  %v1677_v26 = vld [vmem:[#allocation3] sm:$0xff]  ;;  %v1688_v34 = vand.u32 127, %v93_v28  ;;  %vm618_vm9 = vcmask 261120  }
  0x13   :  { %v1648_v17 = vld [vmem:[#allocation3 + $0x58] sm:$0xff]  ;;  %v1661_v20 = vld [vmem:[#allocation3 + $0x68] sm:$0xff]  ;;  %104 = vst [vmem:[#allocation1] ss:$2 sm:$0xff] %v1677_v26  ;;  %v1684_v32 = vld [vmem:[#allocation3 + $0x10] sm:$0xff]  ;;  %s1505_s24 = smov 32  }
  0x14   :  { %v1670_v23 = vld [vmem:[#allocation3 + $0x78] sm:$0xff]  ;;  %vm389_vm0 = vcmp.lt.s32.totalorder %v1688_v34, 111  ;;  %v1700_v40 = vld [vmem:[#allocation3 + $0x20] sm:$0xff]  ;;  %v1712_v47 = vld [vmem:[#allocation3 + $0x30] sm:$0xff]  ;;  %vm303_vm1 = vcmp.lt.s32.totalorder %v1688_v34, 113  ;;  %vm266_vm2 = vcmp.lt.s32.totalorder %v1688_v34, 127 }
  0x15   :  { %2268 = vst [vmem:[#allocation13_spill] sm:$0xff] %v1670_v23  ;;  %v1730_v56 = vld [vmem:[#allocation3 + $0x40] sm:$0xff]  ;;  %vm352_vm3 = vcmp.lt.s32.totalorder %v1688_v34, 112  ;;  %vm131_vm4 = vcmp.lt.s32.totalorder %v1688_v34, 16  ;;  %vm217_vm5 = vcmp.lt.s32.totalorder %v1688_v34, 1  ;;  %vm95_vm6 = vcmp.lt.s32.totalorder %v1688_v34, 17 }
  0x16   :  { %vm180_vm7 = vcmp.lt.s32.totalorder %v1688_v34, 15 }
  0x18   :  { %387 = vrot.lane.b32.xlu2 %v1549_v0, %s1496_s16  ;;  %381 = vrot.lane.b32.xlu1 %v1559_v2, %s1496_s16  ;;  %v1596_v5 = vld.sshfl [vmem:[#allocation1 + $0x10] sm:$0xff pattern:$0x75316420]  ;;  %v1598_v6 = vld.sshfl [vmem:[#allocation1 + $0x18] sm:$0xff pattern:$0x75316420] }
  0x19   :  { %299 = vrot.lane.b32.xlu0 %v1554_v1, %s1495_s15  ;;  %143 = vst [vmem:[#allocation1 + $0x10] ss:$2 sm:$0xff] %v1600_v7 }
  0x1a   :  { %v1682_v31 = vld.sshfl [vmem:[#allocation1] sm:$0xff pattern:$0x75316420]  ;;  %v1686_v33 = vld.sshfl [vmem:[#allocation1 + $0x8] sm:$0xff pattern:$0x75316420] }
  0x1b   :  { %141 = vst [vmem:[#allocation1] ss:$2 sm:$0xff] %v1684_v32 }
  0x20   :  { %264 = vrot.lane.b32.xlu2 %v1549_v0, %s1497_s17  ;;  %262 = vrot.lane.b32.xlu1 %v1554_v1, %s1497_s17  ;;  %v1611_v9 = vld.sshfl [vmem:[#allocation1 + $0x10] sm:$0xff pattern:$0x75316420]  ;;  %v1613_v10 = vld.sshfl [vmem:[#allocation1 + $0x18] sm:$0xff pattern:$0x75316420] }
  0x21   :  { %258 = vrot.lane.b32.xlu0 %v1559_v2, %s1497_s17  ;;  %192 = vst [vmem:[#allocation1 + $0x10] ss:$2 sm:$0xff] %v1609_v8 }
  0x22   :  { %v1702_v41 = vld.sshfl [vmem:[#allocation1] sm:$0xff pattern:$0x75316420]  ;;  %v1704_v42 = vld.sshfl [vmem:[#allocation1 + $0x8] sm:$0xff pattern:$0x75316420] }
  0x23   :  { %190 = vst [vmem:[#allocation1] ss:$2 sm:$0xff] %v1700_v40 }
  0x28   :  { %350 = vrot.lane.b32.xlu2 %v1549_v0, %s1498_s18  ;;  %348 = vrot.lane.b32.xlu1 %v1554_v1, %s1498_s18  ;;  %v1624_v12 = vld.sshfl [vmem:[#allocation1 + $0x10] sm:$0xff pattern:$0x75316420]  ;;  %v1626_v13 = vld.sshfl [vmem:[#allocation1 + $0x18] sm:$0xff pattern:$0x75316420] }
  0x29   :  { %344 = vrot.lane.b32.xlu0 %v1559_v2, %s1498_s18  ;;  %229 = vst [vmem:[#allocation1 + $0x10] ss:$2 sm:$0xff] %v1622_v11 }
  0x2a   :  { %v1714_v48 = vld.sshfl [vmem:[#allocation1] sm:$0xff pattern:$0x75316420]  ;;  %v1716_v49 = vld.sshfl [vmem:[#allocation1 + $0x8] sm:$0xff pattern:$0x75316420] }
  0x2b   :  { %227 = vst [vmem:[#allocation1] ss:$2 sm:$0xff] %v1712_v47 }
  0x30   :  { %129 = vrot.lane.b32.xlu2 %v1549_v0, %s1493_s6  ;;  %127 = vrot.lane.b32.xlu1 %v1554_v1, %s1493_s6  ;;  %v1637_v15 = vld.sshfl [vmem:[#allocation1 + $0x10] sm:$0xff pattern:$0x75316420]  ;;  %v1639_v16 = vld.sshfl [vmem:[#allocation1 + $0x18] sm:$0xff pattern:$0x75316420] }
  0x31   :  { %125 = vrot.lane.b32.xlu0 %v1588_v4, %s1493_s6  ;;  %278 = vst [vmem:[#allocation1 + $0x10] ss:$2 sm:$0xff] %v1635_v14 }
  0x32   :  { %v1732_v58 = vld.sshfl [vmem:[#allocation1] sm:$0xff pattern:$0x75316420]  ;;  %v1734_v59 = vld.sshfl [vmem:[#allocation1 + $0x8] sm:$0xff pattern:$0x75316420] }
  0x33   :  { %276 = vst [vmem:[#allocation1] ss:$2 sm:$0xff] %v1730_v56 }
  0x38   :  { %215 = vrot.lane.b32.xlu2 %v1549_v0, %s1499_s21  ;;  %213 = vrot.lane.b32.xlu1 %v1554_v1, %s1499_s21  ;;  %v1650_v18 = vld.sshfl [vmem:[#allocation1 + $0x10] sm:$0xff pattern:$0x75316420]  ;;  %v1652_v19 = vld.sshfl [vmem:[#allocation1 + $0x18] sm:$0xff pattern:$0x75316420] }
  0x39   :  { %211 = vrot.lane.b32.xlu0 %v1588_v4, %s1499_s21  ;;  %315 = vst [vmem:[#allocation1 + $0x10] ss:$2 sm:$0xff] %v1648_v17 }
  0x3a   :  { %v1752_v28 = vld.sshfl [vmem:[#allocation1] sm:$0xff pattern:$0x75316420] }
  0x40   :  { %91 = vrot.lane.b32.xlu2 %v1549_v0, %s1500_s22  ;;  %89 = vrot.lane.b32.xlu1 %v1554_v1, %s1500_s22  ;;  %v1663_v21 = vld.sshfl [vmem:[#allocation1 + $0x10] sm:$0xff pattern:$0x75316420]  ;;  %v319_v22 = vld.sshfl [vmem:[#allocation1 + $0x18] sm:$0xff pattern:$0x75316420] }
  0x41   :  { %87 = vrot.lane.b32.xlu0 %v1588_v4, %s1500_s22  ;;  %364 = vst [vmem:[#allocation1 + $0x10] ss:$2 sm:$0xff] %v1661_v20 }
  0x48   :  { %178 = vrot.lane.b32.xlu2 %v1549_v0, %s1501_s23  ;;  %176 = vrot.lane.b32.xlu1 %v1554_v1, %s1501_s23  ;;  %v1672_v24 = vld.sshfl [vmem:[#allocation1 + $0x10] sm:$0xff pattern:$0x75316420]  ;;  %v1674_v25 = vld.sshfl [vmem:[#allocation1 + $0x18] sm:$0xff pattern:$0x75316420] }
  0x49   :  { %174 = vrot.lane.b32.xlu0 %v1588_v4, %s1501_s23  ;;  %401 = vst [vmem:[#allocation1 + $0x10] ss:$2 sm:$0xff] %v1670_v23 }
  0x50   :  { %260 = vrot.lane.b32.xlu2 %v1588_v4, %s1497_s17  ;;  %383 = vrot.lane.b32.xlu1 %v1588_v4, %s1496_s16  ;;  %v404_v29 = vld.sshfl [vmem:[#allocation1 + $0x10] sm:$0xff pattern:$0x75316420]  ;;  %v405_v30 = vld.sshfl [vmem:[#allocation1 + $0x18] sm:$0xff pattern:$0x75316420] }
  0x51   :  { %297 = vrot.lane.b32.xlu0 %v1588_v4, %s1495_s15  ;;  %712 = vst [vmem:[#allocation1 + $0x10] ss:$2 sm:$0xff] %v101_v3 }
  0x58   :  { %209 = vrot.lane.b32.xlu2 %v1559_v2, %s1499_s21  ;;  %123 = vrot.lane.b32.xlu1 %v1559_v2, %s1493_s6  ;;  %v1695_v37 = vld.sshfl [vmem:[#allocation1 + $0x10] sm:$0xff pattern:$0x75316420]  ;;  %v1697_v38 = vld.sshfl [vmem:[#allocation1 + $0x18] sm:$0xff pattern:$0x75316420] }
  0x59   :  { %346 = vrot.lane.b32.xlu0 %v1588_v4, %s1498_s18  ;;  %2269 = vst [vmem:[#allocation14_spill] sm:$0xff] %v1695_v37 }
  0x5a   :  { %2270 = vst [vmem:[#allocation15_spill] sm:$0xff] %v1697_v38 }
  0x5b   :  { %747 = vst [vmem:[#allocation1 + $0x10] ss:$2 sm:$0xff] %v1600_v7  ;;  %v1746_v7 = vld [vmem:[#allocation3 + $0x50] sm:$0xff] }
  0x60   :  { %172 = vrot.lane.b32.xlu1 %v1559_v2, %s1501_s23 }
  0x61   :  { %85 = vrot.lane.b32.xlu0 %v1559_v2, %s1500_s22 }
  0x62   :  { %v1707_v45 = vld.sshfl [vmem:[#allocation1 + $0x10] sm:$0xff pattern:$0x75316420]  ;;  %v1709_v46 = vld.sshfl [vmem:[#allocation1 + $0x18] sm:$0xff pattern:$0x75316420] }
  0x63   :  { %2271 = vst [vmem:[#allocation16_spill] sm:$0xff] %v1707_v45 }
  0x64   :  { %2272 = vst [vmem:[#allocation17_spill] sm:$0xff] %v1709_v46 }
  0x65   :  { %794 = vst [vmem:[#allocation1 + $0x10] ss:$2 sm:$0xff] %v1609_v8 }
  0x6a   :  { %v1680_v27 = vpop.permute.xlu2 %385 }
  0x6c   :  { %v1722_v53 = vld.sshfl [vmem:[#allocation1 + $0x10] sm:$0xff pattern:$0x75316420]  ;;  %v1724_v54 = vld.sshfl [vmem:[#allocation1 + $0x18] sm:$0xff pattern:$0x75316420] }
  0x6d   :  { %2273 = vst [vmem:[#allocation18_spill] sm:$0xff] %v1722_v53 }
  0x6e   :  { %2274 = vst [vmem:[#allocation19_spill] sm:$0xff] %v1724_v54 }
  0x6f   :  { %829 = vst [vmem:[#allocation1 + $0x10] ss:$2 sm:$0xff] %v1622_v11 }
  0x72   :  { %v388_v35 = vpop.permute.xlu2 %387 }
  0x73   :  { %v390_v36 = vsel %vm389_vm0, %v1680_v27, %v388_v35 }
  0x74   :  { %v412_v39 = vmul.f32 %v404_v29, %v390_v36  ;;  %v1754_v29 = vld.sshfl [vmem:[#allocation1 + $0x8] sm:$0xff pattern:$0x75316420] }
  0x75   :  { %313 = vst [vmem:[#allocation1] ss:$2 sm:$0xff] %v1746_v7 }
  0x76   :  { %v420_v43 = vrot.slane %v412_v39, 4 }
  0x78   :  { %428 = vst [vmem:[#allocation2 + $0x20] sm:$0xf0] %v420_v43 }
  0x7a   :  { %v265_v44 = vpop.permute.xlu2 %264 }
  0x82   :  { %v302_v50 = vpop.permute.xlu1 %301  ;;  %v351_v51 = vpop.permute.xlu2 %350 }
  0x83   :  { %v1720_v52 = vpop.permute.xlu0 %295 }
  0x84   :  { %v307_v55 = vsel %vm303_vm1, %v302_v50, %v1720_v52 }
  0x85   :  { %v327_v57 = vmul.f32 %v319_v22, %v307_v55 }
  0x87   :  { %v335_v60 = vrot.slane %v327_v57, 4  ;;  %v1765_v57 = vld [vmem:[#allocation3 + $0x60] sm:$0xff] }
  0x89   :  { %343 = vst [vmem:[#allocation2 + $0x58] sm:$0xf0] %v335_v60 }
  0x8a   :  { %v1737_v61 = vpop.permute.xlu2 %129  ;;  %v1739_v62 = vpop.permute.xlu1 %381 }
  0x8b   :  { %v393_v63 = vsel %vm389_vm0, %v388_v35, %v1739_v62  ;;  %v1744_v3 = vpop.permute.xlu0 %299 }
  0x8c   :  { %v413_v8 = vmul.f32 %v405_v30, %v393_v63  ;;  %v304_v11 = vsel %vm303_vm1, %v1744_v3, %v302_v50  ;;  %v1768_v63 = vld.sshfl [vmem:[#allocation1] sm:$0xff pattern:$0x75316420] }
  0x8d   :  { %v326_v22 = vmul.f32 %v1663_v21, %v304_v11 }
  0x8e   :  { %v421_v36 = vrot.slane %v413_v8, 4  ;;  %v1770_v8 = vld.sshfl [vmem:[#allocation1 + $0x8] sm:$0xff pattern:$0x75316420] }
  0x8f   :  { %v334_v39 = vrot.slane %v326_v22, 4  ;;  %362 = vst [vmem:[#allocation1] ss:$2 sm:$0xff] %v1765_v57 }
  0x90   :  { %429 = vst [vmem:[#allocation2 + $0x8] sm:$0xf0] %v421_v36 }
  0x91   :  { %342 = vst [vmem:[#allocation2 + $0x30] sm:$0xf0] %v334_v39 }
  0x92   :  { %v1758_v35 = vpop.permute.xlu2 %215  ;;  %v263_v30 = vpop.permute.xlu1 %262 }
  0x93   :  { %v267_v43 = vsel %vm266_vm2, %v263_v30, %v265_v44  ;;  %v259_v50 = vpop.permute.xlu0 %258 }
  0x94   :  { %v289_v21 = vmul.f32 %v1650_v18, %v267_v43  ;;  %v270_v55 = vsel %vm266_vm2, %v265_v44, %v259_v50  ;;  %v1788_v43 = vld [vmem:[#allocation3 + $0x70] sm:$0xff] }
  0x95   :  { %v290_v60 = vmul.f32 %v1652_v19, %v270_v55  ;;  %2275 = vst [vmem:[#allocation20_spill] sm:$0xff] %v1788_v43 }
  0x96   :  { %293 = vst [vmem:[#allocation2 + $0x30] sm:$0xf] %v289_v21  ;;  %v1790_v21 = vld.sshfl [vmem:[#allocation1] sm:$0xff pattern:$0x75316420] }
  0x97   :  { %294 = vst [vmem:[#allocation2 + $0x58] sm:$0xf] %v290_v60  ;;  %v1793_v55 = vld.sshfl [vmem:[#allocation1 + $0x8] sm:$0xff pattern:$0x75316420] }
  0x98   :  { %399 = vst [vmem:[#allocation1] ss:$2 sm:$0xff] %v1788_v43 }
  0x9a   :  { %v1774_v11 = vpop.permute.xlu2 %91  ;;  %v1776_v18 = vpop.permute.xlu1 %348 }
  0x9b   :  { %v353_v44 = vsel %vm352_vm3, %v1776_v18, %v351_v51  ;;  %v1781_v22 = vpop.permute.xlu0 %344 }
  0x9c   :  { %v375_v19 = vmul.f32 %v1672_v24, %v353_v44  ;;  %v356_v36 = vsel %vm352_vm3, %v351_v51, %v1781_v22 }
  0x9d   :  { %v376_v39 = vmul.f32 %v1674_v25, %v356_v36 }
  0x9e   :  { %379 = vst [vmem:[#allocation2 + $0x20] sm:$0xf] %v375_v19  ;;  %v453_v38 = vld [vmem:[#allocation2 + $0x58] sm:$0xff] }
  0x9f   :  { %380 = vst [vmem:[#allocation2 + $0x8] sm:$0xf] %v376_v39  ;;  %v452_v39 = vld [vmem:[#allocation2 + $0x30] sm:$0xff]  ;;  %v402_v43 = vld.sshfl [vmem:[#allocation1] sm:$0xff pattern:$0x75316420] }
  0xa2   :  { %v1796_v60 = vpop.permute.xlu2 %178  ;;  %v128_v24 = vpop.permute.xlu1 %127 }
  0xa3   :  { %v132_v51 = vsel %vm131_vm4, %v128_v24, %v1737_v61  ;;  %v1801_v25 = vpop.permute.xlu0 %125 }
  0xa4   :  { %v155_v44 = vmul.f32 %v1613_v10, %v132_v51  ;;  %v133_v19 = vsel %vm131_vm4, %v1801_v25, %v128_v24  ;;  %v403_v10 = vld.sshfl [vmem:[#allocation1 + $0x8] sm:$0xff pattern:$0x75316420] }
  0xa5   :  { %v154_v36 = vmul.f32 %v1611_v9, %v133_v19  ;;  %v456_v53 = vld [vmem:[#allocation2 + $0x20] sm:$0xff]  ;;  %710 = vst [vmem:[#allocation1] ss:$2 sm:$0xff] %v1677_v26 }
  0xa6   :  { %v163_v37 = vrot.slane %v155_v44, 4  ;;  %v468_v54 = vpack.c.bf16 %v456_v53, %v452_v39  ;;  %v457_v45 = vld [vmem:[#allocation2 + $0x8] sm:$0xff] }
  0xa7   :  { %v162_v46 = vrot.slane %v154_v36, 4  ;;  %v469_v23 = vpack.c.bf16 %v457_v45, %v453_v38 }
  0xa8   :  { %171 = vst [vmem:[#allocation2 + $0x98] sm:$0xf0] %v163_v37  ;;  %554 = vmatpush.bf16.msra.mxu2 %v468_v54 }
  0xa9   :  { %170 = vst [vmem:[#allocation2 + $0x18] sm:$0xf0] %v162_v46  ;;  %573 = vmatpush.bf16.msra.mxu3 %v469_v23 }
  0xaa   :  { %v261_v51 = vpop.permute.xlu2 %260  ;;  %v214_v24 = vpop.permute.xlu1 %213 }
  0xab   :  { %v268_v9 = vsel %vm266_vm2, %v261_v51, %v263_v30  ;;  %v269_v53 = vsel %vm266_vm2, %v259_v50, %v261_v51  ;;  %v218_v37 = vsel %vm217_vm5, %v214_v24, %v1758_v35  ;;  %v212_v38 = vpop.permute.xlu0 %211 }
  0xac   :  { %v287_v45 = vmul.f32 %v1752_v28, %v269_v53  ;;  %v288_v23 = vmul.f32 %v1754_v29, %v268_v9  ;;  %v241_v46 = vmul.f32 %v1639_v16, %v218_v37  ;;  %v219_v26 = vsel %vm217_vm5, %v212_v38, %v214_v24  ;;  %v1824_v44 = vld.sshfl [vmem:[#allocation1] sm:$0xff pattern:$0x75316420]  ;;  %v1826_v29 = vld.sshfl [vmem:[#allocation1 + $0x8] sm:$0xff pattern:$0x75316420] }
  0xad   :  { %v240_v54 = vmul.f32 %v1637_v15, %v219_v26  ;;  %745 = vst [vmem:[#allocation1] ss:$2 sm:$0xff] %v1684_v32 }
  0xae   :  { %291 = vst [vmem:[#allocation2 + $0xa8] sm:$0xf] %v287_v45  ;;  %v249_v30 = vrot.slane %v241_v46, 4 }
  0xaf   :  { %292 = vst [vmem:[#allocation2 + $0x68] sm:$0xf] %v288_v23  ;;  %v248_v50 = vrot.slane %v240_v54, 4 }
  0xb0   :  { %257 = vst [vmem:[#allocation2 + $0xa0] sm:$0xf0] %v249_v30 }
  0xb1   :  { %256 = vst [vmem:[#allocation2 + $0x70] sm:$0xf0] %v248_v50 }
  0xb2   :  { %v210_v28 = vpop.permute.xlu2 %209  ;;  %v90_v19 = vpop.permute.xlu1 %89 }
  0xb3   :  { %v220_v16 = vsel %vm217_vm5, %v210_v28, %v212_v38  ;;  %v221_v15 = vsel %vm217_vm5, %v1758_v35, %v210_v28  ;;  %v96_v36 = vsel %vm95_vm6, %v90_v19, %v1774_v11  ;;  %v1836_v39 = vpop.permute.xlu0 %87 }
  0xb4   :  { %v238_v51 = vmul.f32 %v1732_v58, %v221_v15  ;;  %v239_v24 = vmul.f32 %v1734_v59, %v220_v16  ;;  %v118_v9 = vmul.f32 %v1598_v6, %v96_v36  ;;  %v97_v53 = vsel %vm95_vm6, %v1836_v39, %v90_v19 }
  0xb5   :  { %v117_v35 = vmul.f32 %v1596_v5, %v97_v53 }
  0xb6   :  { %v246_v37 = vrot.slane %v238_v51, 4  ;;  %v247_v38 = vrot.slane %v239_v24, 4  ;;  %122 = vst [vmem:[#allocation2 + $0x98] sm:$0xf] %v118_v9 }
  0xb7   :  { %121 = vst [vmem:[#allocation2 + $0x18] sm:$0xf] %v117_v35  ;;  %v470_v35 = vld [vmem:[%s2263_s3] sm:$0xff] }
  0xb8   :  { %254 = vst [vmem:[#allocation2 + $0x38] sm:$0xf0] %v246_v37 }
  0xb9   :  { %255 = vst [vmem:[#allocation2 + $0x50] sm:$0xf0] %v247_v38 }
  0xba   :  { %v177_v32 = vpop.permute.xlu1 %176 }
  0xbb   :  { %v181_v58 = vsel %vm180_vm7, %v177_v32, %v1796_v60  ;;  %v1850_v6 = vpop.permute.xlu0 %174 }
  0xbc   :  { %v204_v59 = vmul.f32 %v1626_v13, %v181_v58  ;;  %v182_v5 = vsel %vm180_vm7, %v1850_v6, %v177_v32  ;;  %v1894_v58 = vld [vmem:[#allocation6] sm:$0xff] }
  0xbd   :  { %v203_v45 = vmul.f32 %v1624_v12, %v182_v5 }
  0xbe   :  { %208 = vst [vmem:[#allocation2 + $0xa0] sm:$0xf] %v204_v59  ;;  %v444_v15 = vld [vmem:[#allocation2 + $0x18] sm:$0xff]  ;;  %v1502_v59 = vmov 0  }
  0xbf   :  { %207 = vst [vmem:[#allocation2 + $0x70] sm:$0xf] %v203_v45  ;;  %1385 = vset.pattern.permute.xlu1 %v1502_v59  ;;  %1384 = vset.pattern.permute.xlu0 %v1502_v59 }
  0xc0   :  { %476 = vperm.xlu1 %1385, %v470_v35   ;;  %1383 = vset.pattern.permute.xlu2 %v1502_v59 }
  0xc2   :  { %v384_v23 = vpop.permute.xlu1 %383 }
  0xc3   :  { %v391_v46 = vsel %vm389_vm0, %v384_v23, %v1680_v27  ;;  %v392_v26 = vsel %vm389_vm0, %v1739_v62, %v384_v23  ;;  %v298_v54 = vpop.permute.xlu0 %297  ;;  %v445_v27 = vld [vmem:[#allocation2 + $0x98] sm:$0xff]  ;;  %v1874_v62 = vld [vmem:[%s2260_s0 + $0x38] sm:$0xff] }
  0xc4   :  { %v410_v30 = vmul.f32 %v402_v43, %v392_v26  ;;  %v411_v13 = vmul.f32 %v403_v10, %v391_v46  ;;  %v305_v50 = vsel %vm303_vm1, %v298_v54, %v1744_v3  ;;  %v306_v12 = vsel %vm303_vm1, %v1720_v52, %v298_v54  ;;  %v1879_v52 = vld [vmem:[%s2260_s0 + $0x30] sm:$0xff] }
  0xc5   :  { %v324_v28 = vmul.f32 %v1768_v63, %v306_v12  ;;  %v325_v19 = vmul.f32 %v1770_v8, %v305_v50  ;;  %v449_v16 = vld [vmem:[#allocation2 + $0xa0] sm:$0xff]  ;;  %v461_v24 = vpack.c.bf16 %v1874_v62, %v1549_v0  ;;  %v460_v9 = vpack.c.bf16 %v1879_v52, %v1554_v1 }
  0xc6   :  { %v418_v43 = vrot.slane %v410_v30, 4  ;;  %v419_v10 = vrot.slane %v411_v13, 4  ;;  %v448_v36 = vld [vmem:[#allocation2 + $0x70] sm:$0xff]  ;;  %v465_v3 = vpack.c.bf16 %v449_v16, %v445_v27 }
  0xc7   :  { %v332_v63 = vrot.slane %v324_v28, 4  ;;  %v333_v51 = vrot.slane %v325_v19, 4  ;;  %v464_v8 = vpack.c.bf16 %v448_v36, %v444_v15  ;;  %v1941_v36 = vld [vmem:[%s2260_s0 + $0x28] sm:$0xff] }
  0xc8   :  { %426 = vst [vmem:[#allocation2 + $0x80] sm:$0xf0] %v418_v43  ;;  %574 = vmatpush.bf16.msra.mxu3 %v465_v3  ;;  %v1936_v43 = vld [vmem:[%s2260_s0 + $0x20] sm:$0xff]  ;;  %v471_v3 = vld [vmem:[%s2263_s3 + $0x8] sm:$0xff] }
  0xc9   :  { %427 = vst [vmem:[#allocation2 + $0xb8] sm:$0xf0] %v419_v10  ;;  %555 = vmatpush.bf16.msra.mxu2 %v464_v8  ;;  %v459_v8 = vpack.c.bf16 %v1941_v36, %v1588_v4 }
  0xca   :  { %340 = vst [vmem:[#allocation2 + $0xa8] sm:$0xf0] %v332_v63  ;;  %v124_v53 = vpop.permute.xlu1 %123 }
  0xcb   :  { %341 = vst [vmem:[#allocation2 + $0x68] sm:$0xf0] %v333_v51  ;;  %v134_v37 = vsel %vm131_vm4, %v124_v53, %v1801_v25  ;;  %v135_v38 = vsel %vm131_vm4, %v1737_v61, %v124_v53  ;;  %v347_v32 = vpop.permute.xlu0 %346  ;;  %v458_v51 = vpack.c.bf16 %v1936_v43, %v1559_v2 }
  0xcc   :  { %v152_v5 = vmul.f32 %v1702_v41, %v135_v38  ;;  %v153_v45 = vmul.f32 %v1704_v42, %v134_v37  ;;  %v354_v23 = vsel %vm352_vm3, %v347_v32, %v1776_v18  ;;  %v355_v25 = vsel %vm352_vm3, %v1781_v22, %v347_v32  ;;  %575 = vmatpush.bf16.msra.mxu3 %v461_v24 }
  0xcd   :  { %v373_v61 = vmul.f32 %v1790_v21, %v355_v25  ;;  %556 = vmatpush.bf16.msra.mxu2 %v460_v9  ;;  %v374_v54 = vmul.f32 %v1793_v55, %v354_v23 }
  0xce   :  { %v160_v46 = vrot.slane %v152_v5, 4  ;;  %v161_v26 = vrot.slane %v153_v45, 4 }
  0xcf   :  { %377 = vst [vmem:[#allocation2 + $0x80] sm:$0xf] %v373_v61  ;;  %1321 = vmatmul.msk.bf16.vlgmr.msra.gmra.mxu3 %vm504_vm8, %v1894_v58 }
  0xd0   :  { %168 = vst [vmem:[#allocation2 + $0x88] sm:$0xf0] %v160_v46  ;;  %1319 = vmatmul.msk.bf16.vlgmr.msra.gmra.mxu2 %vm504_vm8, %v1894_v58 }
  0xd1   :  { %169 = vst [vmem:[#allocation2 + $0x90] sm:$0xf0] %v161_v26  ;;  %v450_v12 = vld [vmem:[#allocation2 + $0xa8] sm:$0xff] }
  0xd2   :  { %378 = vst [vmem:[#allocation2 + $0xb8] sm:$0xf] %v374_v54  ;;  %v173_v41 = vpop.permute.xlu1 %172 }
  0xd3   :  { %v183_v42 = vsel %vm180_vm7, %v173_v41, %v1850_v6  ;;  %v184_v18 = vsel %vm180_vm7, %v1796_v60, %v173_v41  ;;  %v86_v22 = vpop.permute.xlu0 %85 }
  0xd4   :  { %v201_v21 = vmul.f32 %v1714_v48, %v184_v18  ;;  %v202_v55 = vmul.f32 %v1716_v49, %v183_v42  ;;  %v98_v30 = vsel %vm95_vm6, %v86_v22, %v1836_v39  ;;  %v99_v13 = vsel %vm95_vm6, %v1774_v11, %v86_v22  ;;  %v451_v48 = vld [vmem:[#allocation2 + $0x68] sm:$0xff]  ;;  %v473_v39 = vld [vmem:[%s2263_s3 + $0x18] sm:$0xff] }
  0xd5   :  { %v115_v50 = vmul.f32 %v1682_v31, %v99_v13  ;;  %v116_v6 = vmul.f32 %v1686_v33, %v98_v30  ;;  %v472_v31 = vld [vmem:[%s2263_s3 + $0x10] sm:$0xff]  ;;  %491 = vperm.xlu0 %1384, %v473_v39  }
  0xd6   :  { %205 = vst [vmem:[#allocation2 + $0x38] sm:$0xf] %v201_v21  ;;  %v454_v60 = vld [vmem:[#allocation2 + $0x80] sm:$0xff]  ;;  %v1360_v33 = vld [vmem:[#allocation6 + $0x8] sm:$0xff]  ;;  %486 = vperm.xlu2 %1383, %v472_v31  }
  0xd7   :  { %206 = vst [vmem:[#allocation2 + $0x50] sm:$0xf] %v202_v55  ;;  %v466_v28 = vpack.c.bf16 %v454_v60, %v450_v12 }
  0xd8   :  { %119 = vst [vmem:[#allocation2 + $0x88] sm:$0xf] %v115_v50 }
  0xd9   :  { %120 = vst [vmem:[#allocation2 + $0x90] sm:$0xf] %v116_v6  ;;  %516 = vmatpush.bf16.msra.mxu0 %v466_v28  ;;  %v455_v49 = vld [vmem:[#allocation2 + $0xb8] sm:$0xff] }
  0xda   :  { %v467_v19 = vpack.c.bf16 %v455_v49, %v451_v48 }
  0xdc   :  { %535 = vmatpush.bf16.msra.mxu1 %v467_v19 }
  0xdd   :  { %v446_v11 = vld [vmem:[#allocation2 + $0x38] sm:$0xff] }
  0xde   :  { %v447_v27 = vld [vmem:[#allocation2 + $0x50] sm:$0xff]  ;;  %481 = vperm.xlu2 %1383, %v471_v3  }
  0xdf   :  { %1322 = vmatmul.msk.bf16.gmra.mxu3 %vm504_vm8, %v1360_v33  ;;  %v442_v16 = vld [vmem:[#allocation2 + $0x88] sm:$0xff] }
  0xe0   :  { %v462_v10 = vpack.c.bf16 %v446_v11, %v442_v16  ;;  %v443_v15 = vld [vmem:[#allocation2 + $0x90] sm:$0xff]  ;;  %1320 = vmatmul.msk.bf16.gmra.mxu2 %vm504_vm8, %v1360_v33  ;;  %v1361_v11 = vld [vmem:[#allocation8] sm:$0xff] }
  0xe1   :  { %v463_v63 = vpack.c.bf16 %v447_v27, %v443_v15 }
  0xe2   :  { %517 = vmatpush.bf16.msra.mxu0 %v462_v10 }
  0xe3   :  { %536 = vmatpush.bf16.msra.mxu1 %v463_v63 }
  0xe6   :  { %518 = vmatpush.bf16.msra.mxu0 %v458_v51 }
  0xe7   :  { %537 = vmatpush.bf16.msra.mxu1 %v459_v8 }
  0xe9   :  { %1315 = vmatmul.msk.bf16.vlgmr.msra.gmra.mxu0 %vm504_vm8, %v1894_v58 }
  0xea   :  { %1317 = vmatmul.msk.bf16.vlgmr.msra.gmra.mxu1 %vm504_vm8, %v1894_v58 }
  0xf9   :  { %1316 = vmatmul.msk.bf16.gmra.mxu0 %vm504_vm8, %v1360_v33 }
  0xfa   :  { %1318 = vmatmul.msk.bf16.gmra.mxu1 %vm504_vm8, %v1360_v33 }
 0x130   :  { %v487_v37 = vpop.permute.xlu2 %486 }
 0x132   :  { %v477_v25 = vpop.permute.xlu1 %476 }
 0x138   :  { %v482_v45 = vpop.permute.xlu2 %481 }
 0x147   :  { %v492_v61 = vpop.permute.xlu0 %491 }
 0x152   :  { %v577_v24 = vpop.f32.mrf.mxu3 }
 0x153   :  { %v558_v9 = vpop.f32.mrf.mxu2  ;;  %v578_v22 = vadd.f32 %v577_v24, %v477_v25 }
 0x154   :  { %v559_v54 = vadd.f32 %v558_v9, %v477_v25 }
 0x155   :  { %v590_v49 = vmax.f32 %v578_v22, 0.0 }
 0x156   :  { %v589_v60 = vmax.f32 %v559_v54, 0.0 }
 0x15a   :  { %v579_v53 = vpop.f32.mrf.mxu3 }
 0x15b   :  { %v560_v35 = vpop.f32.mrf.mxu2  ;;  %v580_v21 = vadd.f32 %v579_v53, %v482_v45 }
 0x15c   :  { %v561_v26 = vadd.f32 %v560_v35, %v482_v45 }
 0x15d   :  { %v594_v19 = vmax.f32 %v580_v21, 0.0 }
 0x15e   :  { %v593_v50 = vmax.f32 %v561_v26, 0.0 }
 0x15f   :  { %v608_v33 = vpack.c.bf16 %v594_v19, %v590_v49 }
 0x160   :  { %v607_v31 = vpack.c.bf16 %v593_v50, %v589_v60 }
 0x162   :  { %v582_v38 = vpop.f32.mrf.mxu3 }
 0x163   :  { %v563_v32 = vpop.f32.mrf.mxu2  ;;  %v583_v5 = vadd.f32 %v582_v38, %v487_v37 }
 0x164   :  { %v564_v46 = vadd.f32 %v563_v32, %v487_v37 }
 0x165   :  { %v598_v41 = vmax.f32 %v583_v5, 0.0 }
 0x166   :  { %v520_v59 = vpop.f32.mrf.mxu0  ;;  %v597_v55 = vmax.f32 %v564_v46, 0.0 }
 0x167   :  { %v539_v23 = vpop.f32.mrf.mxu1  ;;  %v521_v35 = vadd.f32 %v520_v59, %v477_v25 }
 0x168   :  { %v540_v24 = vadd.f32 %v539_v23, %v477_v25 }
 0x16a   :  { %v584_v58 = vpop.f32.mrf.mxu3  ;;  %v588_v54 = vmax.f32 %v540_v24, 0.0 }
 0x16b   :  { %v585_v42 = vadd.f32 %v584_v58, %v492_v61  ;;  %v565_v18 = vpop.f32.mrf.mxu2 }
 0x16c   :  { %v566_v30 = vadd.f32 %v565_v18, %v492_v61  ;;  %v587_v18 = vmax.f32 %v521_v35, 0.0 }
 0x16d   :  { %v602_v13 = vmax.f32 %v585_v42, 0.0 }
 0x16e   :  { %v522_v6 = vpop.f32.mrf.mxu0  ;;  %v601_v12 = vmax.f32 %v566_v30, 0.0 }
 0x16f   :  { %v541_v28 = vpop.f32.mrf.mxu1  ;;  %v612_v48 = vpack.c.bf16 %v602_v13, %v598_v41  ;;  %v523_v63 = vadd.f32 %v522_v6, %v482_v45 }
 0x170   :  { %v611_v39 = vpack.c.bf16 %v601_v12, %v597_v55  ;;  %v542_v9 = vadd.f32 %v541_v28, %v482_v45  ;;  %v2054_v28 = vld.sshfl [vmem:[#allocation1 + $0x18] sm:$0xff pattern:$0x75316420] }
 0x171   :  { %670 = vmatpush.bf16.msrb.mxu3 %v612_v48  ;;  %v591_v26 = vmax.f32 %v523_v63, 0.0 }
 0x172   :  { %656 = vmatpush.bf16.msrb.mxu2 %v611_v39  ;;  %v592_v41 = vmax.f32 %v542_v9, 0.0 }
 0x174   :  { %v606_v22 = vpack.c.bf16 %v592_v41, %v588_v54 }
 0x175   :  { %671 = vmatpush.bf16.msrb.mxu3 %v608_v33 }
 0x176   :  { %v525_v27 = vpop.f32.mrf.mxu0  ;;  %657 = vmatpush.bf16.msrb.mxu2 %v607_v31 }
 0x177   :  { %v544_v16 = vpop.f32.mrf.mxu1  ;;  %v526_v10 = vadd.f32 %v525_v27, %v487_v37 }
 0x178   :  { %1330 = vmatmul.msk.bf16.vlgmr.msrb.gmra.mxu3 %vm618_vm9, %v1361_v11  ;;  %v545_v15 = vadd.f32 %v544_v16, %v487_v37  ;;  %v605_v37 = vpack.c.bf16 %v591_v26, %v587_v18 }
 0x179   :  { %1329 = vmatmul.msk.bf16.vlgmr.msrb.gmra.mxu2 %vm618_vm9, %v1361_v11  ;;  %v595_v38 = vmax.f32 %v526_v10, 0.0 }
 0x17a   :  { %v596_v5 = vmax.f32 %v545_v15, 0.0  ;;  %v2277_v15 = vld [vmem:[#allocation13_spill] sm:$0xff] }
 0x17e   :  { %v527_v3 = vpop.f32.mrf.mxu0 }
 0x17f   :  { %v528_v51 = vadd.f32 %v527_v3, %v492_v61  ;;  %v546_v8 = vpop.f32.mrf.mxu1  ;;  %v1331_v3 = vld [vmem:[%s2263_s3 + $0x20] sm:$0xff] }
 0x180   :  { %v547_v53 = vadd.f32 %v546_v8, %v492_v61 }
 0x181   :  { %v599_v32 = vmax.f32 %v528_v51, 0.0 }
 0x182   :  { %v600_v46 = vmax.f32 %v547_v53, 0.0 }
 0x183   :  { %v609_v58 = vpack.c.bf16 %v599_v32, %v595_v38 }
 0x184   :  { %v610_v42 = vpack.c.bf16 %v600_v46, %v596_v5 }
 0x185   :  { %628 = vmatpush.bf16.msrb.mxu0 %v609_v58 }
 0x186   :  { %642 = vmatpush.bf16.msrb.mxu1 %v610_v42 }
 0x189   :  { %629 = vmatpush.bf16.msrb.mxu0 %v605_v37 }
 0x18a   :  { %643 = vmatpush.bf16.msrb.mxu1 %v606_v22 }
 0x18c   :  { %1327 = vmatmul.msk.bf16.vlgmr.msrb.gmra.mxu0 %vm618_vm9, %v1361_v11 }
 0x18d   :  { %1328 = vmatmul.msk.bf16.vlgmr.msrb.gmra.mxu1 %vm618_vm9, %v1361_v11 }
 0x1fb   :  { %v673_v59 = vpop.f32.mrf.mxu3 }
 0x1fc   :  { %v1962_v45 = vadd.f32 %v673_v59, %v1549_v0  ;;  %v659_v23 = vpop.f32.mrf.mxu2 }
 0x1fd   :  { %v1965_v25 = vadd.f32 %v659_v23, %v1554_v1 }
 0x1fe   :  { %899 = vrot.lane.b32.xlu0 %v1962_v45, %s1495_s15 }
 0x203   :  { %v675_v61 = vpop.f32.mrf.mxu3 }
 0x204   :  { %v1970_v21 = vadd.f32 %v675_v61, %v1874_v62  ;;  %v661_v55 = vpop.f32.mrf.mxu2 }
 0x205   :  { %v1975_v30 = vadd.f32 %v661_v55, %v1879_v52 }
 0x206   :  { %981 = vrot.lane.b32.xlu0 %v1962_v45, %s1496_s16 }
 0x209   :  { %v631_v0 = vpop.f32.mrf.mxu0 }
 0x20a   :  { %v1978_v13 = vadd.f32 %v631_v0, %v1559_v2  ;;  %v645_v1 = vpop.f32.mrf.mxu1 }
 0x20b   :  { %v1981_v50 = vadd.f32 %v645_v1, %v1588_v4  ;;  %v2019_v4 = vld.sshfl [vmem:[#allocation1] sm:$0xff pattern:$0x75316420] }
 0x20c   :  { %893 = vrot.lane.b32.xlu1 %v1978_v13, %s1495_s15 }
 0x20d   :  { %977 = vrot.lane.b32.xlu2 %v1981_v50, %s1496_s16 }
 0x20e   :  { %864 = vrot.lane.b32.xlu0 %v1962_v45, %s1497_s17 }
 0x211   :  { %v633_v62 = vpop.f32.mrf.mxu0 }
 0x212   :  { %v1990_v52 = vadd.f32 %v633_v62, %v1936_v43  ;;  %v647_v6 = vpop.f32.mrf.mxu1  ;;  %v2021_v43 = vld.sshfl [vmem:[#allocation1 + $0x8] sm:$0xff pattern:$0x75316420] }
 0x213   :  { %v1993_v2 = vadd.f32 %v647_v6, %v1941_v36  ;;  %792 = vst [vmem:[#allocation1] ss:$2 sm:$0xff] %v1700_v40 }
 0x214   :  { %975 = vrot.lane.b32.xlu1 %v1978_v13, %s1496_s16 }
 0x215   :  { %897 = vrot.lane.b32.xlu2 %v1965_v25, %s1495_s15 }
 0x216   :  { %946 = vrot.lane.b32.xlu0 %v1962_v45, %s1498_s18 }
 0x21a   :  { %v2030_v36 = vld.sshfl [vmem:[#allocation1] sm:$0xff pattern:$0x75316420]  ;;  %v2032_v12 = vld.sshfl [vmem:[#allocation1 + $0x8] sm:$0xff pattern:$0x75316420] }
 0x21b   :  { %827 = vst [vmem:[#allocation1] ss:$2 sm:$0xff] %v1712_v47  ;;  %v2052_v47 = vld.sshfl [vmem:[#allocation1 + $0x10] sm:$0xff pattern:$0x75316420] }
 0x21c   :  { %858 = vrot.lane.b32.xlu1 %v1978_v13, %s1497_s17  ;;  %876 = vst [vmem:[#allocation1 + $0x10] ss:$2 sm:$0xff] %v1635_v14 }
 0x21d   :  { %979 = vrot.lane.b32.xlu2 %v1965_v25, %s1496_s16 }
 0x21e   :  { %735 = vrot.lane.b32.xlu0 %v1962_v45, %s1493_s6 }
 0x222   :  { %v2041_v40 = vld.sshfl [vmem:[#allocation1] sm:$0xff pattern:$0x75316420]  ;;  %v2043_v60 = vld.sshfl [vmem:[#allocation1 + $0x8] sm:$0xff pattern:$0x75316420] }
 0x223   :  { %874 = vst [vmem:[#allocation1] ss:$2 sm:$0xff] %v1730_v56  ;;  %v1333_v56 = vld [vmem:[%s2263_s3 + $0x30] sm:$0xff]  ;;  %v2069_v39 = vld.sshfl [vmem:[#allocation1 + $0x18] sm:$0xff pattern:$0x75316420] }
 0x224   :  { %940 = vrot.lane.b32.xlu1 %v1978_v13, %s1498_s18  ;;  %v879_v19 = vld.sshfl [vmem:[#allocation1 + $0x10] sm:$0xff pattern:$0x75316420] }
 0x225   :  { %862 = vrot.lane.b32.xlu2 %v1965_v25, %s1497_s17  ;;  %911 = vst [vmem:[#allocation1 + $0x10] ss:$2 sm:$0xff] %v1648_v17 }
 0x226   :  { %817 = vrot.lane.b32.xlu0 %v1962_v45, %s1499_s21 }
 0x22a   :  { %v2057_v48 = vld.sshfl [vmem:[#allocation1] sm:$0xff pattern:$0x75316420]  ;;  %v2059_v49 = vld.sshfl [vmem:[#allocation1 + $0x8] sm:$0xff pattern:$0x75316420] }
 0x22b   :  { %909 = vst [vmem:[#allocation1] ss:$2 sm:$0xff] %v1746_v7  ;;  %v1332_v7 = vld [vmem:[%s2263_s3 + $0x28] sm:$0xff] }
 0x22c   :  { %731 = vrot.lane.b32.xlu1 %v1981_v50, %s1493_s6  ;;  %v914_v33 = vld.sshfl [vmem:[#allocation1 + $0x10] sm:$0xff pattern:$0x75316420]  ;;  %v915_v11 = vld.sshfl [vmem:[#allocation1 + $0x18] sm:$0xff pattern:$0x75316420] }
 0x22d   :  { %944 = vrot.lane.b32.xlu2 %v1965_v25, %s1498_s18  ;;  %958 = vst [vmem:[#allocation1 + $0x10] ss:$2 sm:$0xff] %v1661_v20  ;;  %v1334_v20 = vld [vmem:[%s2263_s3 + $0x38] sm:$0xff]  ;;  %s1503_s3 = smov [#allocation9]  }
 0x22e   :  { %700 = vrot.lane.b32.xlu0 %v1962_v45, %s1500_s22  ;;  %s1291_s19 = sshll.u32 %s1503_s3, 4  ;;  %s1292_s19 = int_to_ptr.vmem [resolvable:$true] %s1291_s19 }
 0x232   :  { %v2072_v14 = vld.sshfl [vmem:[#allocation1] sm:$0xff pattern:$0x75316420]  ;;  %v2074_v31 = vld.sshfl [vmem:[#allocation1 + $0x8] sm:$0xff pattern:$0x75316420] }
 0x233   :  { %956 = vst [vmem:[#allocation1] ss:$2 sm:$0xff] %v1765_v57  ;;  %v2276_v57 = vld [vmem:[#allocation20_spill] sm:$0xff] }
 0x234   :  { %813 = vrot.lane.b32.xlu1 %v1981_v50, %s1499_s21  ;;  %v961_v16 = vld.sshfl [vmem:[#allocation1 + $0x10] sm:$0xff pattern:$0x75316420]  ;;  %v2094_v10 = vld.sshfl [vmem:[#allocation1 + $0x18] sm:$0xff pattern:$0x75316420] }
 0x235   :  { %733 = vrot.lane.b32.xlu2 %v1965_v25, %s1493_s6  ;;  %993 = vst [vmem:[#allocation1 + $0x10] ss:$2 sm:$0xff] %v2277_v15 }
 0x236   :  { %782 = vrot.lane.b32.xlu0 %v1962_v45, %s1501_s23 }
 0x23a   :  { %v2085_v17 = vld.sshfl [vmem:[#allocation1] sm:$0xff pattern:$0x75316420]  ;;  %v2087_v27 = vld.sshfl [vmem:[#allocation1 + $0x8] sm:$0xff pattern:$0x75316420] }
 0x23b   :  { %991 = vst [vmem:[#allocation1] ss:$2 sm:$0xff] %v2276_v57 }
 0x23c   :  { %696 = vrot.lane.b32.xlu1 %v1981_v50, %s1500_s22  ;;  %v996_v32 = vld.sshfl [vmem:[#allocation1 + $0x10] sm:$0xff pattern:$0x75316420]  ;;  %v997_v62 = vld.sshfl [vmem:[#allocation1 + $0x18] sm:$0xff pattern:$0x75316420] }
 0x23d   :  { %815 = vrot.lane.b32.xlu2 %v1965_v25, %s1499_s21 }
 0x23e   :  { %860 = vrot.lane.b32.xlu0 %v1981_v50, %s1497_s17 }
 0x242   :  { %v995_v35 = vld.sshfl [vmem:[#allocation1 + $0x8] sm:$0xff pattern:$0x75316420]  ;;  %v994_v1 = vld.sshfl [vmem:[#allocation1] sm:$0xff pattern:$0x75316420] }
 0x244   :  { %778 = vrot.lane.b32.xlu1 %v1981_v50, %s1501_s23 }
 0x245   :  { %698 = vrot.lane.b32.xlu2 %v1965_v25, %s1500_s22 }
 0x246   :  { %811 = vrot.lane.b32.xlu0 %v1978_v13, %s1499_s21 }
 0x24c   :  { %895 = vrot.lane.b32.xlu1 %v1981_v50, %s1495_s15 }
 0x24d   :  { %780 = vrot.lane.b32.xlu2 %v1965_v25, %s1501_s23 }
 0x24e   :  { %1080 = vperm.xlu0 %1384, %v1333_v56  }
 0x254   :  { %942 = vrot.lane.b32.xlu1 %v1981_v50, %s1498_s18 }
 0x255   :  { %729 = vrot.lane.b32.xlu2 %v1978_v13, %s1493_s6 }
 0x256   :  { %1075 = vperm.xlu0 %1384, %v1332_v7  }
 0x25c   :  { %694 = vrot.lane.b32.xlu1 %v1978_v13, %s1500_s22  ;;  %s1293_s22 = sshll.u32 %s2265_s5, 4  ;;  %s1294_s22 = int_to_ptr.hbm [resolvable:$true] %s1293_s22 }
 0x25d   :  { %776 = vrot.lane.b32.xlu2 %v1978_v13, %s1501_s23  ;;  %s1504_s23 = smov 512  }
 0x264   :  { %1085 = vperm.xlu1 %1385, %v1334_v20  }
 0x265   :  { %1070 = vperm.xlu2 %1383, %v1331_v3  }
 0x267   :  { %v978_v63 = vpop.permute.xlu2 %977 }
 0x26f   :  { %v2103_v51 = vpop.permute.xlu2 %897 }
 0x270   :  { %v900_v8 = vpop.permute.xlu0 %899 }
 0x271   :  { %v901_v24 = vsel %vm303_vm1, %v2103_v51, %v900_v8 }
 0x272   :  { %v922_v9 = vmul.f32 %v914_v33, %v901_v24 }
 0x274   :  { %v930_v53 = vrot.slane %v922_v9, 4 }
 0x276   :  { %938 = vst [vmem:[#allocation2 + $0x30] sm:$0xf0] %v930_v53 }
 0x277   :  { %v980_v38 = vpop.permute.xlu2 %979 }
 0x278   :  { %v984_v5 = vsel %vm389_vm0, %v978_v63, %v980_v38  ;;  %v982_v46 = vpop.permute.xlu0 %981 }
 0x279   :  { %v1003_v26 = vmul.f32 %v995_v35, %v984_v5  ;;  %v983_v58 = vsel %vm389_vm0, %v980_v38, %v982_v46 }
 0x27a   :  { %v1004_v54 = vmul.f32 %v996_v32, %v983_v58  ;;  %v2278_v32 = vld [vmem:[#allocation17_spill] sm:$0xff] }
 0x27b   :  { %v1011_v41 = vrot.slane %v1003_v26, 4 }
 0x27c   :  { %v1012_v42 = vrot.slane %v1004_v54, 4 }
 0x27d   :  { %1019 = vst [vmem:[#allocation2 + $0xb8] sm:$0xf0] %v1011_v41 }
 0x27e   :  { %1020 = vst [vmem:[#allocation2 + $0x20] sm:$0xf0] %v1012_v42  ;;  %v2112_v18 = vpop.permute.xlu1 %893 }
 0x27f   :  { %v2114_v37 = vpop.permute.xlu2 %862  ;;  %v904_v22 = vsel %vm303_vm1, %v900_v8, %v2112_v18 }
 0x280   :  { %v923_v59 = vmul.f32 %v915_v11, %v904_v22  ;;  %v865_v23 = vpop.permute.xlu0 %864 }
 0x281   :  { %v866_v61 = vsel %vm266_vm2, %v2114_v37, %v865_v23 }
 0x282   :  { %v931_v55 = vrot.slane %v923_v59, 4  ;;  %v887_v0 = vmul.f32 %v879_v19, %v866_v61 }
 0x284   :  { %939 = vst [vmem:[#allocation2 + $0x58] sm:$0xf0] %v931_v55 }
 0x285   :  { %891 = vst [vmem:[#allocation2 + $0x30] sm:$0xf] %v887_v0 }
 0x286   :  { %v976_v6 = vpop.permute.xlu1 %975 }
 0x287   :  { %v2122_v56 = vpop.permute.xlu2 %944  ;;  %v985_v7 = vsel %vm389_vm0, %v976_v6, %v978_v63  ;;  %v986_v33 = vsel %vm389_vm0, %v982_v46, %v976_v6 }
 0x288   :  { %v1002_v11 = vmul.f32 %v994_v1, %v985_v7  ;;  %v1005_v57 = vmul.f32 %v997_v62, %v986_v33  ;;  %v947_v15 = vpop.permute.xlu0 %946  ;;  %v2279_v62 = vld [vmem:[#allocation16_spill] sm:$0xff] }
 0x289   :  { %v948_v19 = vsel %vm352_vm3, %v2122_v56, %v947_v15 }
 0x28a   :  { %v1010_v20 = vrot.slane %v1002_v11, 4  ;;  %v1013_v3 = vrot.slane %v1005_v57, 4  ;;  %v969_v8 = vmul.f32 %v961_v16, %v948_v19 }
 0x28c   :  { %1018 = vst [vmem:[#allocation2 + $0x80] sm:$0xf0] %v1010_v20  ;;  %v1045_v26 = vld [vmem:[#allocation2 + $0x30] sm:$0xff] }
 0x28d   :  { %1021 = vst [vmem:[#allocation2 + $0x8] sm:$0xf0] %v1013_v3 }
 0x28e   :  { %973 = vst [vmem:[#allocation2 + $0x20] sm:$0xf] %v969_v8  ;;  %v859_v24 = vpop.permute.xlu1 %858 }
 0x28f   :  { %v734_v9 = vpop.permute.xlu2 %733  ;;  %v869_v63 = vsel %vm266_vm2, %v865_v23, %v859_v24 }
 0x290   :  { %v888_v53 = vmul.f32 %v2069_v39, %v869_v63  ;;  %v736_v35 = vpop.permute.xlu0 %735 }
 0x291   :  { %v737_v38 = vsel %vm131_vm4, %v734_v9, %v736_v35 }
 0x292   :  { %892 = vst [vmem:[#allocation2 + $0x58] sm:$0xf] %v888_v53  ;;  %v759_v5 = vmul.f32 %v2278_v32, %v737_v38  ;;  %v2281_v32 = vld [vmem:[#allocation19_spill] sm:$0xff] }
 0x294   :  { %v767_v46 = vrot.slane %v759_v5, 4 }
 0x295   :  { %v1049_v16 = vld [vmem:[#allocation2 + $0x20] sm:$0xff] }
 0x296   :  { %775 = vst [vmem:[#allocation2 + $0x98] sm:$0xf0] %v767_v46  ;;  %v2137_v58 = vpop.permute.xlu1 %940  ;;  %v1061_v54 = vpack.c.bf16 %v1049_v16, %v1045_v26 }
 0x297   :  { %v816_v41 = vpop.permute.xlu2 %815  ;;  %v951_v42 = vsel %vm352_vm3, %v947_v15, %v2137_v58  ;;  %v2280_v15 = vld [vmem:[#allocation15_spill] sm:$0xff] }
 0x298   :  { %v970_v39 = vmul.f32 %v2094_v10, %v951_v42  ;;  %1147 = vmatpush.bf16.msra.mxu2 %v1061_v54  ;;  %v2143_v22 = vpop.permute.xlu0 %817 }
 0x299   :  { %v819_v59 = vsel %vm217_vm5, %v816_v41, %v2143_v22  ;;  %v1046_v33 = vld [vmem:[#allocation2 + $0x58] sm:$0xff] }
 0x29a   :  { %974 = vst [vmem:[#allocation2 + $0x8] sm:$0xf] %v970_v39  ;;  %v841_v23 = vmul.f32 %v2054_v28, %v819_v59 }
 0x29c   :  { %v849_v61 = vrot.slane %v841_v23, 4 }
 0x29e   :  { %857 = vst [vmem:[#allocation2 + $0xa0] sm:$0xf0] %v849_v61  ;;  %v732_v55 = vpop.permute.xlu1 %731 }
 0x29f   :  { %v699_v0 = vpop.permute.xlu2 %698  ;;  %v738_v1 = vsel %vm131_vm4, %v732_v55, %v734_v9 }
 0x2a0   :  { %v758_v6 = vmul.f32 %v2279_v62, %v738_v1  ;;  %v2152_v10 = vpop.permute.xlu0 %700 }
 0x2a1   :  { %v702_v7 = vsel %vm95_vm6, %v699_v0, %v2152_v10  ;;  %v1050_v11 = vld [vmem:[#allocation2 + $0x8] sm:$0xff] }
 0x2a2   :  { %v766_v57 = vrot.slane %v758_v6, 4  ;;  %v724_v28 = vmul.f32 %v2280_v15, %v702_v7  ;;  %v1062_v19 = vpack.c.bf16 %v1050_v11, %v1046_v33  ;;  %v1054_v15 = vpack.c.bf16 %v1970_v21, %v1962_v45 }
 0x2a4   :  { %774 = vst [vmem:[#allocation2 + $0x18] sm:$0xf0] %v766_v57  ;;  %1166 = vmatpush.bf16.msra.mxu3 %v1062_v19 }
 0x2a5   :  { %728 = vst [vmem:[#allocation2 + $0x98] sm:$0xf] %v724_v28 }
 0x2a6   :  { %v814_v20 = vpop.permute.xlu1 %813 }
 0x2a7   :  { %v781_v3 = vpop.permute.xlu2 %780  ;;  %v820_v8 = vsel %vm217_vm5, %v814_v20, %v816_v41  ;;  %v2282_v41 = vld [vmem:[#allocation14_spill] sm:$0xff] }
 0x2a8   :  { %v840_v9 = vmul.f32 %v2052_v47, %v820_v8  ;;  %v783_v63 = vpop.permute.xlu0 %782 }
 0x2a9   :  { %v784_v53 = vsel %vm180_vm7, %v781_v3, %v783_v63 }
 0x2aa   :  { %v848_v38 = vrot.slane %v840_v9, 4  ;;  %v806_v5 = vmul.f32 %v2281_v32, %v784_v53  ;;  %v2201_v53 = vld [vmem:[#allocation6 + $0x10] sm:$0xff] }
 0x2ac   :  { %856 = vst [vmem:[#allocation2 + $0x70] sm:$0xf0] %v848_v38  ;;  %v1038_v6 = vld [vmem:[#allocation2 + $0x98] sm:$0xff] }
 0x2ad   :  { %810 = vst [vmem:[#allocation2 + $0xa0] sm:$0xf] %v806_v5 }
 0x2ae   :  { %v2164_v46 = vpop.permute.xlu1 %696 }
 0x2af   :  { %v730_v26 = vpop.permute.xlu2 %729  ;;  %v703_v16 = vsel %vm95_vm6, %v2164_v46, %v699_v0 }
 0x2b0   :  { %v739_v54 = vsel %vm131_vm4, %v730_v26, %v732_v55  ;;  %v740_v47 = vsel %vm131_vm4, %v736_v35, %v730_v26  ;;  %v723_v42 = vmul.f32 %v2282_v41, %v703_v16  ;;  %v861_v39 = vpop.permute.xlu0 %860 }
 0x2b1   :  { %v756_v59 = vmul.f32 %v2019_v4, %v740_v47  ;;  %v757_v23 = vmul.f32 %v2021_v43, %v739_v54  ;;  %v867_v61 = vsel %vm266_vm2, %v861_v39, %v2114_v37  ;;  %v868_v0 = vsel %vm266_vm2, %v859_v24, %v861_v39 }
 0x2b2   :  { %727 = vst [vmem:[#allocation2 + $0x18] sm:$0xf] %v723_v42  ;;  %v885_v55 = vmul.f32 %v2057_v48, %v868_v0  ;;  %v886_v35 = vmul.f32 %v2059_v49, %v867_v61  ;;  %v2283_v49 = vld [vmem:[#allocation18_spill] sm:$0xff] }
 0x2b3   :  { %v764_v1 = vrot.slane %v756_v59, 4  ;;  %v765_v62 = vrot.slane %v757_v23, 4  ;;  %v1363_v42 = vld [vmem:[#allocation6 + $0x18] sm:$0xff] }
 0x2b4   :  { %889 = vst [vmem:[#allocation2 + $0xa8] sm:$0xf] %v885_v55  ;;  %v1042_v7 = vld [vmem:[#allocation2 + $0xa0] sm:$0xff] }
 0x2b5   :  { %772 = vst [vmem:[#allocation2 + $0x88] sm:$0xf0] %v764_v1  ;;  %v1058_v4 = vpack.c.bf16 %v1042_v7, %v1038_v6 }
 0x2b6   :  { %773 = vst [vmem:[#allocation2 + $0x90] sm:$0xf0] %v765_v62  ;;  %v779_v43 = vpop.permute.xlu1 %778 }
 0x2b7   :  { %890 = vst [vmem:[#allocation2 + $0x68] sm:$0xf] %v886_v35  ;;  %v777_v33 = vpop.permute.xlu2 %776  ;;  %v785_v37 = vsel %vm180_vm7, %v779_v43, %v781_v3  ;;  %1167 = vmatpush.bf16.msra.mxu3 %v1058_v4 }
 0x2b8   :  { %v787_v48 = vsel %vm180_vm7, %v783_v63, %v777_v33  ;;  %v786_v24 = vsel %vm180_vm7, %v777_v33, %v779_v43  ;;  %v805_v11 = vmul.f32 %v2283_v49, %v785_v37  ;;  %v812_v57 = vpop.permute.xlu0 %811 }
 0x2b9   :  { %v803_v28 = vmul.f32 %v2030_v36, %v787_v48  ;;  %v804_v19 = vmul.f32 %v2032_v12, %v786_v24  ;;  %v821_v3 = vsel %vm217_vm5, %v812_v57, %v814_v20  ;;  %v822_v8 = vsel %vm217_vm5, %v2143_v22, %v812_v57  ;;  %v1037_v32 = vld [vmem:[#allocation2 + $0x18] sm:$0xff] }
 0x2ba   :  { %809 = vst [vmem:[#allocation2 + $0x70] sm:$0xf] %v805_v11  ;;  %v838_v9 = vmul.f32 %v2041_v40, %v822_v8  ;;  %v839_v63 = vmul.f32 %v2043_v60, %v821_v3 }
 0x2bb   :  { %807 = vst [vmem:[#allocation2 + $0x38] sm:$0xf] %v803_v28  ;;  %1168 = vmatpush.bf16.msra.mxu3 %v1054_v15 }
 0x2bc   :  { %808 = vst [vmem:[#allocation2 + $0x50] sm:$0xf] %v804_v19  ;;  %v846_v36 = vrot.slane %v838_v9, 4  ;;  %v847_v38 = vrot.slane %v839_v63, 4 }
 0x2be   :  { %854 = vst [vmem:[#allocation2 + $0x38] sm:$0xf0] %v846_v36  ;;  %v896_v12 = vpop.permute.xlu1 %895  ;;  %1349 = vmatmul.msk.bf16.vlgmr.msra.gmra.mxu3 %vm504_vm8, %v2201_v53 }
 0x2bf   :  { %855 = vst [vmem:[#allocation2 + $0x50] sm:$0xf0] %v847_v38  ;;  %v902_v22 = vsel %vm303_vm1, %v896_v12, %v2103_v51  ;;  %v903_v40 = vsel %vm303_vm1, %v2112_v18, %v896_v12  ;;  %v1053_v51 = vpack.c.bf16 %v1975_v30, %v1965_v25  ;;  %v1071_v19 = vpop.permute.xlu2 %1070 }
 0x2c0   :  { %v920_v60 = vmul.f32 %v2072_v14, %v903_v40  ;;  %v921_v20 = vmul.f32 %v2074_v31, %v902_v22  ;;  %v1081_v43 = vpop.permute.xlu0 %1080 }
 0x2c1   :  { %v1041_v5 = vld [vmem:[#allocation2 + $0x70] sm:$0xff] }
 0x2c2   :  { %v928_v26 = vrot.slane %v920_v60, 4  ;;  %v929_v16 = vrot.slane %v921_v20, 4  ;;  %v1057_v54 = vpack.c.bf16 %v1041_v5, %v1037_v32  ;;  %v1364_v60 = vld [vmem:[#allocation8 + $0x8] sm:$0xff] }
 0x2c4   :  { %936 = vst [vmem:[#allocation2 + $0xa8] sm:$0xf0] %v928_v26  ;;  %1148 = vmatpush.bf16.msra.mxu2 %v1057_v54 }
 0x2c5   :  { %937 = vst [vmem:[#allocation2 + $0x68] sm:$0xf0] %v929_v16 }
 0x2c6   :  { %v943_v47 = vpop.permute.xlu1 %942  ;;  %v1040_v34 = vld [vmem:[#allocation2 + $0x50] sm:$0xff] }
 0x2c7   :  { %v949_v18 = vsel %vm352_vm3, %v943_v47, %v2122_v56  ;;  %v950_v14 = vsel %vm352_vm3, %v2137_v58, %v943_v47 }
 0x2c8   :  { %v967_v31 = vmul.f32 %v2085_v17, %v950_v14  ;;  %v968_v41 = vmul.f32 %v2087_v27, %v949_v18  ;;  %1149 = vmatpush.bf16.msra.mxu2 %v1053_v51  ;;  %v1076_v24 = vpop.permute.xlu0 %1075 }
 0x2ca   :  { %971 = vst [vmem:[#allocation2 + $0x80] sm:$0xf] %v967_v31 }
 0x2cb   :  { %972 = vst [vmem:[#allocation2 + $0xb8] sm:$0xf] %v968_v41  ;;  %1347 = vmatmul.msk.bf16.vlgmr.msra.gmra.mxu2 %vm504_vm8, %v2201_v53  ;;  %v1043_v59 = vld [vmem:[#allocation2 + $0xa8] sm:$0xff] }
 0x2cc   :  { %v1044_v0 = vld [vmem:[#allocation2 + $0x68] sm:$0xff] }
 0x2ce   :  { %v695_v39 = vpop.permute.xlu1 %694  ;;  %1350 = vmatmul.msk.bf16.gmra.mxu3 %vm504_vm8, %v1363_v42 }
 0x2cf   :  { %v704_v56 = vsel %vm95_vm6, %v695_v39, %v2164_v46  ;;  %v705_v17 = vsel %vm95_vm6, %v2152_v10, %v695_v39  ;;  %v1039_v46 = vld [vmem:[#allocation2 + $0x38] sm:$0xff]  ;;  %v1052_v10 = vpack.c.bf16 %v1993_v2, %v1981_v50 }
 0x2d0   :  { %v721_v27 = vmul.f32 %v1824_v44, %v705_v17  ;;  %v722_v58 = vmul.f32 %v1826_v29, %v704_v56  ;;  %v1051_v29 = vpack.c.bf16 %v1990_v52, %v1978_v13 }
 0x2d1   :  { %v1047_v23 = vld [vmem:[#allocation2 + $0x80] sm:$0xff] }
 0x2d2   :  { %725 = vst [vmem:[#allocation2 + $0x88] sm:$0xf] %v721_v27  ;;  %v1059_v61 = vpack.c.bf16 %v1047_v23, %v1043_v59  ;;  %v1048_v55 = vld [vmem:[#allocation2 + $0xb8] sm:$0xff] }
 0x2d3   :  { %726 = vst [vmem:[#allocation2 + $0x90] sm:$0xf] %v722_v58  ;;  %v1060_v1 = vpack.c.bf16 %v1048_v55, %v1044_v0 }
 0x2d4   :  { %1109 = vmatpush.bf16.msra.mxu0 %v1059_v61 }
 0x2d5   :  { %1128 = vmatpush.bf16.msra.mxu1 %v1060_v1 }
 0x2d6   :  { %v1086_v11 = vpop.permute.xlu1 %1085 }
 0x2d9   :  { %v1035_v62 = vld [vmem:[#allocation2 + $0x88] sm:$0xff] }
 0x2da   :  { %v1055_v35 = vpack.c.bf16 %v1039_v46, %v1035_v62  ;;  %v1036_v6 = vld [vmem:[#allocation2 + $0x90] sm:$0xff] }
 0x2db   :  { %1348 = vmatmul.msk.bf16.gmra.mxu2 %vm504_vm8, %v1363_v42  ;;  %v1056_v44 = vpack.c.bf16 %v1040_v34, %v1036_v6 }
 0x2dc   :  { %1110 = vmatpush.bf16.msra.mxu0 %v1055_v35 }
 0x2dd   :  { %1129 = vmatpush.bf16.msra.mxu1 %v1056_v44 }
 0x2e0   :  { %1111 = vmatpush.bf16.msra.mxu0 %v1051_v29 }
 0x2e1   :  { %1130 = vmatpush.bf16.msra.mxu1 %v1052_v10 }
 0x2e3   :  { %1343 = vmatmul.msk.bf16.vlgmr.msra.gmra.mxu0 %vm504_vm8, %v2201_v53 }
 0x2e4   :  { %1345 = vmatmul.msk.bf16.vlgmr.msra.gmra.mxu1 %vm504_vm8, %v2201_v53 }
 0x2f3   :  { %1344 = vmatmul.msk.bf16.gmra.mxu0 %vm504_vm8, %v1363_v42 }
 0x2f4   :  { %1346 = vmatmul.msk.bf16.gmra.mxu1 %vm504_vm8, %v1363_v42 }
 0x341   :  { %v1170_v7 = vpop.f32.mrf.mxu3 }
 0x342   :  { %v1171_v3 = vadd.f32 %v1170_v7, %v1071_v19 }
 0x344   :  { %v1183_v38 = vmax.f32 %v1171_v3, 0.0 }
 0x349   :  { %v1172_v4 = vpop.f32.mrf.mxu3 }
 0x34a   :  { %v1173_v15 = vadd.f32 %v1172_v4, %v1076_v24 }
 0x34c   :  { %v1187_v63 = vmax.f32 %v1173_v15, 0.0 }
 0x34e   :  { %v1151_v33 = vpop.f32.mrf.mxu2  ;;  %v1202_v40 = vpack.c.bf16 %v1187_v63, %v1183_v38 }
 0x34f   :  { %v1152_v54 = vadd.f32 %v1151_v33, %v1071_v19 }
 0x351   :  { %v1175_v37 = vpop.f32.mrf.mxu3  ;;  %v1182_v41 = vmax.f32 %v1152_v54, 0.0 }
 0x352   :  { %v1176_v49 = vadd.f32 %v1175_v37, %v1081_v43 }
 0x354   :  { %v1191_v8 = vmax.f32 %v1176_v49, 0.0 }
 0x356   :  { %v1153_v48 = vpop.f32.mrf.mxu2 }
 0x357   :  { %v1154_v5 = vadd.f32 %v1153_v48, %v1076_v24 }
 0x359   :  { %v1177_v57 = vpop.f32.mrf.mxu3  ;;  %v1186_v14 = vmax.f32 %v1154_v5, 0.0 }
 0x35a   :  { %v1178_v28 = vadd.f32 %v1177_v57, %v1086_v11 }
 0x35b   :  { %v1201_v42 = vpack.c.bf16 %v1186_v14, %v1182_v41 }
 0x35c   :  { %v1195_v9 = vmax.f32 %v1178_v28, 0.0 }
 0x35e   :  { %v1206_v53 = vpack.c.bf16 %v1195_v9, %v1191_v8  ;;  %v1156_v36 = vpop.f32.mrf.mxu2 }
 0x35f   :  { %v1157_v20 = vadd.f32 %v1156_v36, %v1081_v43 }
 0x360   :  { %v1113_v12 = vpop.f32.mrf.mxu0  ;;  %1263 = vmatpush.bf16.msrb.mxu3 %v1206_v53 }
 0x361   :  { %v1132_v22 = vpop.f32.mrf.mxu1  ;;  %v1190_v47 = vmax.f32 %v1157_v20, 0.0  ;;  %v1114_v1 = vadd.f32 %v1113_v12, %v1071_v19 }
 0x362   :  { %v1133_v35 = vadd.f32 %v1132_v22, %v1071_v19 }
 0x363   :  { %v1180_v4 = vmax.f32 %v1114_v1, 0.0 }
 0x364   :  { %1264 = vmatpush.bf16.msrb.mxu3 %v1202_v40  ;;  %v1181_v33 = vmax.f32 %v1133_v35, 0.0 }
 0x366   :  { %v1158_v32 = vpop.f32.mrf.mxu2 }
 0x367   :  { %v1159_v26 = vadd.f32 %v1158_v32, %v1086_v11  ;;  %1358 = vmatmul.msk.bf16.vlgmr.msrb.gmra.mxu3 %vm618_vm9, %v1364_v60 }
 0x368   :  { %v1115_v16 = vpop.f32.mrf.mxu0 }
 0x369   :  { %v1194_v51 = vmax.f32 %v1159_v26, 0.0  ;;  %v1134_v18 = vpop.f32.mrf.mxu1  ;;  %v1116_v59 = vadd.f32 %v1115_v16, %v1076_v24 }
 0x36a   :  { %v1135_v0 = vadd.f32 %v1134_v18, %v1076_v24 }
 0x36b   :  { %v1205_v31 = vpack.c.bf16 %v1194_v51, %v1190_v47  ;;  %v1184_v44 = vmax.f32 %v1116_v59, 0.0 }
 0x36c   :  { %v1185_v10 = vmax.f32 %v1135_v0, 0.0 }
 0x36d   :  { %1249 = vmatpush.bf16.msrb.mxu2 %v1205_v31 }
 0x36e   :  { %v1200_v37 = vpack.c.bf16 %v1185_v10, %v1181_v33 }
 0x370   :  { %v1118_v39 = vpop.f32.mrf.mxu0 }
 0x371   :  { %v1137_v56 = vpop.f32.mrf.mxu1  ;;  %1250 = vmatpush.bf16.msrb.mxu2 %v1201_v42  ;;  %v1119_v17 = vadd.f32 %v1118_v39, %v1081_v43 }
 0x372   :  { %v1138_v27 = vadd.f32 %v1137_v56, %v1081_v43  ;;  %v1199_v43 = vpack.c.bf16 %v1184_v44, %v1180_v4 }
 0x373   :  { %v1188_v62 = vmax.f32 %v1119_v17, 0.0 }
 0x374   :  { %1357 = vmatmul.msk.bf16.vlgmr.msrb.gmra.mxu2 %vm618_vm9, %v1364_v60  ;;  %v1189_v6 = vmax.f32 %v1138_v27, 0.0 }
 0x378   :  { %v1120_v58 = vpop.f32.mrf.mxu0 }
 0x379   :  { %v1121_v23 = vadd.f32 %v1120_v58, %v1086_v11  ;;  %v1139_v61 = vpop.f32.mrf.mxu1 }
 0x37a   :  { %v1140_v55 = vadd.f32 %v1139_v61, %v1086_v11 }
 0x37b   :  { %v1192_v46 = vmax.f32 %v1121_v23, 0.0 }
 0x37c   :  { %v1193_v34 = vmax.f32 %v1140_v55, 0.0 }
 0x37d   :  { %v1203_v29 = vpack.c.bf16 %v1192_v46, %v1188_v62 }
 0x37e   :  { %v1204_v7 = vpack.c.bf16 %v1193_v34, %v1189_v6 }
 0x37f   :  { %1221 = vmatpush.bf16.msrb.mxu0 %v1203_v29 }
 0x380   :  { %1235 = vmatpush.bf16.msrb.mxu1 %v1204_v7 }
 0x383   :  { %1222 = vmatpush.bf16.msrb.mxu0 %v1199_v43 }
 0x384   :  { %1236 = vmatpush.bf16.msrb.mxu1 %v1200_v37 }
 0x386   :  { %1355 = vmatmul.msk.bf16.vlgmr.msrb.gmra.mxu0 %vm618_vm9, %v1364_v60 }
 0x387   :  { %1356 = vmatmul.msk.bf16.vlgmr.msrb.gmra.mxu1 %vm618_vm9, %v1364_v60 }
 0x3ea   :  { %v1266_v48 = vpop.f32.mrf.mxu3 }
 0x3eb   :  { %v1274_v24 = vadd.f32 %v1266_v48, %v1962_v45 }
 0x3ed   :  { %1282 = vst [vmem:[#allocation9 + $0x18] sm:$0xff] %v1274_v24 }
 0x3f2   :  { %v1268_v49 = vpop.f32.mrf.mxu3 }
 0x3f3   :  { %v1278_v11 = vadd.f32 %v1268_v49, %v1970_v21 }
 0x3f5   :  { %1286 = vst [vmem:[#allocation9 + $0x38] sm:$0xff] %v1278_v11 }
 0x3f7   :  { %v1252_v57 = vpop.f32.mrf.mxu2 }
 0x3f8   :  { %v1273_v15 = vadd.f32 %v1252_v57, %v1965_v25 }
 0x3fa   :  { %1281 = vst [vmem:[#allocation9 + $0x10] sm:$0xff] %v1273_v15 }
 0x3ff   :  { %v1254_v28 = vpop.f32.mrf.mxu2 }
 0x400   :  { %v1277_v19 = vadd.f32 %v1254_v28, %v1975_v30 }
 0x402   :  { %1285 = vst [vmem:[#allocation9 + $0x30] sm:$0xff] %v1277_v19 }
 0x403   :  { %v1224_v3 = vpop.f32.mrf.mxu0 }
 0x404   :  { %v1271_v8 = vadd.f32 %v1224_v3, %v1978_v13  ;;  %v1238_v9 = vpop.f32.mrf.mxu1 }
 0x405   :  { %v1272_v63 = vadd.f32 %v1238_v9, %v1981_v50 }
 0x406   :  { %1279 = vst [vmem:[#allocation9] sm:$0xff] %v1271_v8 }
 0x407   :  { %1280 = vst [vmem:[#allocation9 + $0x8] sm:$0xff] %v1272_v63 }
 0x40b   :  { %v1226_v45 = vpop.f32.mrf.mxu0 }
 0x40c   :  { %v1275_v25 = vadd.f32 %v1226_v45, %v1990_v52  ;;  %v1240_v21 = vpop.f32.mrf.mxu1 }
 0x40d   :  { %v1276_v30 = vadd.f32 %v1240_v21, %v1993_v2 }
 0x40e   :  { %1283 = vst [vmem:[#allocation9 + $0x20] sm:$0xff] %v1275_v25 }
 0x40f   :  { %1284 = vst [vmem:[#allocation9 + $0x28] sm:$0xff] %v1276_v30 }
 0x410   :  { %1299 = dma.vmem_to_hbm [thread:$0]  %s1292_s19, 1024, %s1294_s22, [#allocation5], %s1504_s23, %s1504_s23, %s1505_s24  }
 0x411   :  { %1486 = dma.done.wait [#allocation5], 1024  }
 0x412   :  { %1487 = vsyncadd [#allocation5], 4294966272 }
 0x413   :  { %1304 = vsyncpa [#allocation4], 1 }
 0x414   :  { %1305 = vsyncpa [#allocation7], 1 }
 0x415   :  { %1306 = vsyncpa [#allocation5], 1 }

</bundles_post_ra>
